<compile_context>
chip_gen: v5e
topology: v5e:2x2
jax: 0.10.0
libtpu: 0.0.40
codegen_flags: <defaults>
</compile_context>

<pallas_src>
import functools

import numpy as np

import jax
import jax.numpy as jnp
from jax import lax
from jax.experimental import pallas as pl
from jax.experimental.pallas import tpu as pltpu


# ----------------------------------------------------------------------------
# pltpu.roll convention probe (one tiny pallas_call at build time)
# ----------------------------------------------------------------------------
@functools.lru_cache(maxsize=None)
def _roll_mode():
    """+1/-1: pltpu.roll rotation convention; 0: fall back to slice+concat lane shifts."""

    def probe_kernel(x_ref, o_ref):
        o_ref[...] = pltpu.roll(x_ref[...], shift=1, axis=-1)

    x = jnp.tile(jnp.arange(128, dtype=jnp.float32)[None, :], (8, 1))
    try:
        out = pl.pallas_call(
            probe_kernel,
            out_shape=jax.ShapeDtypeStruct((8, 128), jnp.float32),
            grid=(1,),
            in_specs=[pl.BlockSpec((8, 128), lambda i: (0, 0))],
            out_specs=pl.BlockSpec((8, 128), lambda i: (0, 0)),
        )(x)
        row = np.asarray(jax.block_until_ready(out))[0]
    except Exception:
        return 0
    if row[1] == 0.0 and row[2] == 1.0:      # jnp.roll-like: out[i] = in[i - shift]
        return 1
    if row[0] == 1.0 and row[1] == 2.0:      # opposite:      out[i] = in[i + shift]
        return -1
    return 0


def _lane_shift(a, d, roll_mode):
    """Return s with s[c, p] = a[c, (p + d) mod P]: a pure lane rotation (XLU)."""
    p_len = a.shape[-1]
    d = d % p_len
    if d == 0:
        return a
    if roll_mode == 0:
        # Fallback (only if pltpu.roll failed to lower): explicit slice+concat rotate.
        return jnp.concatenate([a[:, d:], a[:, :d]], axis=-1)
    return pltpu.roll(a, shift=((-roll_mode) * d) % p_len, axis=-1)


# ----------------------------------------------------------------------------
# In-kernel building blocks (all operate on lane-dense (C, N*H*W) slabs)
# ----------------------------------------------------------------------------
def _conv3x3(a, w_ref, b_ref, m_ref, row_w, roll_mode):
    """3x3 / stride-1 / zero-pad-1 cross-correlation (PyTorch Conv2d semantics).

    a:     (C, P) with lane index p = n*H*W + h*W + w.
    w_ref: (9, OC, C), tap k = (ky+1)*3 + (kx+1) holds torch_weight[:, :, ky+1, kx+1].
    m_ref: (9, 1, P) per-tap validity mask (zero where the tap falls off the image).
    """
    acc = None
    for i in range(3):
        for j in range(3):
            k = i * 3 + j
            d = (i - 1) * row_w + (j - 1)
            tap = _lane_shift(a, d, roll_mode) * m_ref[k]
            part = jnp.dot(w_ref[k], tap, preferred_element_type=jnp.float32)
            acc = part if acc is None else acc + part
    return acc + b_ref[...]


def _maxpool2x2(a, sel_ref, row_w, roll_mode):
    """2x2 / stride-2 max pool: two pairwise lane maxes + 0/1 lane-compaction matmul."""
    m = jnp.maximum(a, _lane_shift(a, 1, roll_mode))
    m = jnp.maximum(m, _lane_shift(m, row_w, roll_mode))
    return jnp.dot(m, sel_ref[...], preferred_element_type=jnp.float32)


def _fc(a, wlane_ref, nsel_ref, b_ref):
    """torch.nn.Linear on the flattened features, consumed directly from the (C, N*S) slab.

    wlane_ref: (C, NF, N*S) weight re-arranged at build time; nsel_ref: (N*S, N) selector.
    Returns y^T of shape (NF, N).
    """
    z = wlane_ref[0] * a[0:1, :]
    for c in range(1, wlane_ref.shape[0]):
        z = z + wlane_ref[c] * a[c:c + 1, :]
    return jnp.dot(z, nsel_ref[...], preferred_element_type=jnp.float32) + b_ref[...]


def _make_fused_kernel(extracted, row_w1, row_w2, roll_mode):
    """Build the fused conv1->relu1->pool1->conv2->relu2->pool2->fc kernel."""

    def kernel(x_ref, w1_ref, b1_ref, m1_ref, s1_ref,
               w2_ref, b2_ref, m2_ref, s2_ref,
               wfc_ref, nsel_ref, bfc_ref, *out_refs):
        outs = dict(zip(extracted, out_refs))

        def emit(name, value):
            if name in outs:
                outs[name][...] = value

        x = x_ref[...]                                                 # (C0, N*H*W)
        c1 = _conv3x3(x, w1_ref, b1_ref, m1_ref, row_w1, roll_mode)    # (OC1, N*H*W)
        emit("conv1", c1)
        r1 = jnp.maximum(c1, 0.0)
        emit("relu1", r1)
        p1 = _maxpool2x2(r1, s1_ref, row_w1, roll_mode)                # (OC1, N*H*W/4)
        emit("pool1", p1)
        c2 = _conv3x3(p1, w2_ref, b2_ref, m2_ref, row_w2, roll_mode)   # (OC2, N*H*W/4)
        emit("conv2", c2)
        r2 = jnp.maximum(c2, 0.0)
        emit("relu2", r2)
        p2 = _maxpool2x2(r2, s2_ref, row_w2, roll_mode)                # (OC2, N*S)
        emit("pool2", p2)
        # torch's x.view(N, -1) before 'fc' is realised by the (C, N*S) layout together
        # with the pre-arranged fc weight (wlane) and the per-sample selector (nsel).
        emit("fc", _fc(p2, wfc_ref, nsel_ref, bfc_ref))                # (NF, N)

    return kernel


# ----------------------------------------------------------------------------
# Build-time constants (masks, pooling selectors, fc weight re-layout)
# ----------------------------------------------------------------------------
def _stage_constants(n, ht, wd):
    """Per-tap validity masks (9, 1, P) and the 2x2-pool lane-compaction matrix (P, P/4)."""
    p_len = n * ht * wd
    p = np.arange(p_len)
    hh = (p % (ht * wd)) // wd
    ww = p % wd
    masks = np.zeros((9, 1, p_len), np.float32)
    for i in range(3):
        for j in range(3):
            ky, kx = i - 1, j - 1
            ok = (hh + ky >= 0) & (hh + ky < ht) & (ww + kx >= 0) & (ww + kx < wd)
            masks[i * 3 + j, 0, :] = ok.astype(np.float32)
    oh, ow = ht // 2, wd // 2
    sel = np.zeros((p_len, n * oh * ow), np.float32)
    ni, ohi, owi = np.meshgrid(np.arange(n), np.arange(oh), np.arange(ow), indexing="ij")
    src = (ni * ht * wd + 2 * ohi * wd + 2 * owi).ravel()
    dst = (ni * oh * ow + ohi * ow + owi).ravel()
    sel[src, dst] = 1.0
    return jnp.asarray(masks), jnp.asarray(sel)


def _fc_constants(wf, n, c, s):
    """Re-arrange torch Linear weight (NF, C*S) to the kernel's (C, NF, N*S) layout."""
    nf = wf.shape[0]
    w3 = jnp.reshape(wf, (nf, c, s))          # [j, c, s]  (torch flatten index m = c*S + s)
    wlane = jnp.transpose(w3, (1, 0, 2))      # [c, j, s]
    wlane = jnp.tile(wlane, (1, 1, n))        # [c, j, q] = [c, j, q % S]  (q = n*S + s)
    nsel = np.zeros((n * s, n), np.float32)
    nsel[np.arange(n * s), np.arange(n * s) // s] = 1.0
    return wlane, jnp.asarray(nsel)


def _full_spec(shape):
    rank = len(shape)
    return pl.BlockSpec(tuple(shape), lambda *_: (0,) * rank)


# ----------------------------------------------------------------------------
# FeatureExtractor: fused Pallas port of the PyTorch forward loop
# ----------------------------------------------------------------------------
class FeatureExtractor:
    """Keeps the original semantics (traversal order, pre-'fc' flatten, collection of the
    layers named in `extracted_layers`) but runs the whole layer stack in one TPU kernel."""

    LAYERS = ("conv1", "relu1", "pool1", "conv2", "relu2", "pool2", "fc")

    def __init__(self, params, extracted_layers, *, batch, in_ch, height, width):
        wanted = set(extracted_layers)
        self.extracted = tuple(name for name in self.LAYERS if name in wanted)
        if not self.extracted:
            raise ValueError("extracted_layers selects none of the submodule's layers")

        n, c0, ht, wd = batch, in_ch, height, width
        if ht % 4 or wd % 4:
            raise ValueError("two 2x2/stride-2 max pools need H, W divisible by 4")

        w1, b1 = params["conv1"]["w"], params["conv1"]["b"]
        w2, b2 = params["conv2"]["w"], params["conv2"]["b"]
        wf, bf = params["fc"]["w"], params["fc"]["b"]
        oc1, oc2, nf = w1.shape[0], w2.shape[0], wf.shape[0]
        assert w1.shape[1] == c0 and w2.shape[1] == oc1
        ht1, wd1 = ht // 2, wd // 2
        ht2, wd2 = ht // 4, wd // 4
        s_fc = ht2 * wd2
        assert wf.shape[1] == oc2 * s_fc
        p0, p1, p2 = n * ht * wd, n * ht1 * wd1, n * s_fc

        mask1, sel1 = _stage_constants(n, ht, wd)
        mask2, sel2 = _stage_constants(n, ht1, wd1)
        wlane, nsel = _fc_constants(wf, n, oc2, s_fc)

        w1s = jnp.transpose(w1, (2, 3, 0, 1)).reshape(9, oc1, c0)
        w2s = jnp.transpose(w2, (2, 3, 0, 1)).reshape(9, oc2, oc1)
        b1c = jnp.reshape(b1, (oc1, 1))
        b2c = jnp.reshape(b2, (oc2, 1))
        bfc = jnp.reshape(bf, (nf, 1))
        operands = (w1s, b1c, mask1, sel1, w2s, b2c, mask2, sel2, wlane, nsel, bfc)

        shapes2d = {
            "conv1": (oc1, p0), "relu1": (oc1, p0), "pool1": (oc1, p1),
            "conv2": (oc2, p1), "relu2": (oc2, p1), "pool2": (oc2, p2),
            "fc": (nf, n),
        }
        spatial = {
            "conv1": (oc1, ht, wd), "relu1": (oc1, ht, wd), "pool1": (oc1, ht1, wd1),
            "conv2": (oc2, ht1, wd1), "relu2": (oc2, ht1, wd1), "pool2": (oc2, ht2, wd2),
        }

        kernel = _make_fused_kernel(self.extracted, wd, wd1, _roll_mode())

        fused = pl.pallas_call(
            kernel,
            out_shape=[jax.ShapeDtypeStruct(shapes2d[name], jnp.float32)
                       for name in self.extracted],
            grid=(1,),
            in_specs=[_full_spec((c0, p0))] + [_full_spec(op.shape) for op in operands],
            out_specs=[_full_spec(shapes2d[name]) for name in self.extracted],
            compiler_params=pltpu.CompilerParams(dimension_semantics=("arbitrary",)),
        )

        extracted = self.extracted

        def forward(x):
            # NCHW -> lane-dense (C, N*H*W): a few KB of layout plumbing outside the
            # kernel so every in-kernel store is lane-dense.
            x2d = jnp.transpose(x, (1, 0, 2, 3)).reshape(c0, p0)
            outs = fused(x2d, *operands)
            results = []
            for name, o in zip(extracted, outs):
                if name == "fc":
                    results.append(o.T)                                # (NF, N) -> (N, NF)
                else:
                    ch, hh, ww = spatial[name]
                    results.append(o.reshape(ch, n, hh, ww).transpose(1, 0, 2, 3))
            return results

        self._forward = jax.jit(forward)

    def __call__(self, x):
        return self._forward(x)


# ----------------------------------------------------------------------------
# Deterministic synthetic submodule parameters + pure-JAX reference
# ----------------------------------------------------------------------------
def build_params(key):
    k1, k2, k3, k4, k5, k6 = jax.random.split(key, 6)
    return {
        "conv1": {"w": jax.random.normal(k1, (8, 4, 3, 3), jnp.float32) * 0.1,
                  "b": jax.random.normal(k2, (8,), jnp.float32) * 0.1},
        "conv2": {"w": jax.random.normal(k3, (16, 8, 3, 3), jnp.float32) * 0.1,
                  "b": jax.random.normal(k4, (16,), jnp.float32) * 0.1},
        "fc": {"w": jax.random.normal(k5, (32, 16 * 4 * 4), jnp.float32) * 0.05,
               "b": jax.random.normal(k6, (32,), jnp.float32) * 0.05},
    }


def reference_forward(params, x, extracted_layers):
    """Pure-JAX (non-Pallas) replica of the original PyTorch forward loop."""

    def conv(t, wt, bs):
        out = lax.conv_general_dilated(
            t, wt, window_strides=(1, 1), padding=((1, 1), (1, 1)),
            dimension_numbers=("NCHW", "OIHW", "NCHW"))
        return out + bs.reshape(1, -1, 1, 1)

    def pool(t):
        return lax.reduce_window(t, -jnp.inf, lax.max, (1, 1, 2, 2), (1, 1, 2, 2), "VALID")

    modules = [
        ("conv1", lambda t: conv(t, params["conv1"]["w"], params["conv1"]["b"])),
        ("relu1", lambda t: jnp.maximum(t, 0.0)),
        ("pool1", pool),
        ("conv2", lambda t: conv(t, params["conv2"]["w"], params["conv2"]["b"])),
        ("relu2", lambda t: jnp.maximum(t, 0.0)),
        ("pool2", pool),
        ("fc", lambda t: t @ params["fc"]["w"].T + params["fc"]["b"]),
    ]
    outputs = []
    t = x
    for name, fn in modules:
        if name == "fc":
            t = t.reshape(t.shape[0], -1)      # x.view(x.size(0), -1)
        t = fn(t)
        if name in extracted_layers:
            outputs.append(t)
    return outputs


# ----------------------------------------------------------------------------
if __name__ == "__main__":
    key = jax.random.PRNGKey(0)
    kx, kp = jax.random.split(key)

    x = jax.random.normal(kx, (2, 4, 16, 16), jnp.float32)     # NCHW input
    params = build_params(kp)
    extracted_layers = ["relu1", "pool2", "fc"]

    extractor = FeatureExtractor(params, extracted_layers,
                                 batch=2, in_ch=4, height=16, width=16)
    outputs = extractor(x)
    outputs = [jax.block_until_ready(o) for o in outputs]

    expected_shapes = [(2, 8, 16, 16), (2, 16, 4, 4), (2, 32)]
    got_shapes = [tuple(o.shape) for o in outputs]
    assert got_shapes == expected_shapes, got_shapes

    refs = reference_forward(params, x, extracted_layers)
    for name, o, r in zip(extractor.extracted, outputs, refs):
        err = float(jnp.max(jnp.abs(o - r)))
        assert bool(jnp.allclose(o, r, atol=2e-2, rtol=2e-2)), (name, err)

    print("KERNEL_OK")
</pallas_src>

<mosaic_0001>
module attributes {stable_mosaic.version = 11 : i64} {
  func.func @kernel(%arg0: i32, %arg1: memref<4x512xf32, #tpu.memory_space<vmem>>, %arg2: memref<9x8x4xf32, #tpu.memory_space<vmem>>, %arg3: memref<8x1xf32, #tpu.memory_space<vmem>>, %arg4: memref<9x1x512xf32, #tpu.memory_space<vmem>>, %arg5: memref<512x128xf32, #tpu.memory_space<vmem>>, %arg6: memref<9x16x8xf32, #tpu.memory_space<vmem>>, %arg7: memref<16x1xf32, #tpu.memory_space<vmem>>, %arg8: memref<9x1x128xf32, #tpu.memory_space<vmem>>, %arg9: memref<128x32xf32, #tpu.memory_space<vmem>>, %arg10: memref<16x32x32xf32, #tpu.memory_space<vmem>>, %arg11: memref<32x2xf32, #tpu.memory_space<vmem>>, %arg12: memref<32x1xf32, #tpu.memory_space<vmem>>, %arg13: memref<8x512xf32, #tpu.memory_space<vmem>>, %arg14: memref<16x32xf32, #tpu.memory_space<vmem>>, %arg15: memref<32x2xf32, #tpu.memory_space<vmem>>) attributes {dimension_semantics = [#tpu.dimension_semantics<arbitrary>], iteration_bounds = array<i64: 1>, scalar_prefetch = 0 : i64, scratch_operands = 0 : i64, tpu.core_type = #tpu.core_type<tc>, window_params = [{pipeline_mode = #tpu.pipeline_mode<synchronous>, transform_indices = @transform_0, window_bounds = array<i64: 4, 512>}, {pipeline_mode = #tpu.pipeline_mode<synchronous>, transform_indices = @transform_1, window_bounds = array<i64: 9, 8, 4>}, {pipeline_mode = #tpu.pipeline_mode<synchronous>, transform_indices = @transform_2, window_bounds = array<i64: 8, 1>}, {pipeline_mode = #tpu.pipeline_mode<synchronous>, transform_indices = @transform_3, window_bounds = array<i64: 9, 1, 512>}, {pipeline_mode = #tpu.pipeline_mode<synchronous>, transform_indices = @transform_4, window_bounds = array<i64: 512, 128>}, {pipeline_mode = #tpu.pipeline_mode<synchronous>, transform_indices = @transform_5, window_bounds = array<i64: 9, 16, 8>}, {pipeline_mode = #tpu.pipeline_mode<synchronous>, transform_indices = @transform_6, window_bounds = array<i64: 16, 1>}, {pipeline_mode = #tpu.pipeline_mode<synchronous>, transform_indices = @transform_7, window_bounds = array<i64: 9, 1, 128>}, {pipeline_mode = #tpu.pipeline_mode<synchronous>, transform_indices = @transform_8, window_bounds = array<i64: 128, 32>}, {pipeline_mode = #tpu.pipeline_mode<synchronous>, transform_indices = @transform_9, window_bounds = array<i64: 16, 32, 32>}, {pipeline_mode = #tpu.pipeline_mode<synchronous>, transform_indices = @transform_10, window_bounds = array<i64: 32, 2>}, {pipeline_mode = #tpu.pipeline_mode<synchronous>, transform_indices = @transform_11, window_bounds = array<i64: 32, 1>}, {pipeline_mode = #tpu.pipeline_mode<synchronous>, transform_indices = @transform_12, window_bounds = array<i64: 8, 512>}, {pipeline_mode = #tpu.pipeline_mode<synchronous>, transform_indices = @transform_13, window_bounds = array<i64: 16, 32>}, {pipeline_mode = #tpu.pipeline_mode<synchronous>, transform_indices = @transform_14, window_bounds = array<i64: 32, 2>}]} {
    %c0 = arith.constant 0 : index
    %c0_0 = arith.constant 0 : index
    %0 = vector.load %arg1[%c0, %c0_0] : memref<4x512xf32, #tpu.memory_space<vmem>>, vector<4x512xf32>
    %1 = vector.extract_strided_slice %0 {offsets = [0, 495], sizes = [4, 17], strides = [1, 1]} : vector<4x512xf32> to vector<4x17xf32>
    %2 = vector.extract_strided_slice %0 {offsets = [0, 0], sizes = [4, 495], strides = [1, 1]} : vector<4x512xf32> to vector<4x495xf32>
    %3 = tpu.concatenate %1, %2 in 1 : vector<4x17xf32>, vector<4x495xf32> -> vector<4x512xf32>
    %c0_1 = arith.constant 0 : index
    %c0_2 = arith.constant 0 : index
    %c0_3 = arith.constant 0 : index
    %4 = vector.load %arg4[%c0_1, %c0_2, %c0_3] : memref<9x1x512xf32, #tpu.memory_space<vmem>>, vector<1x1x512xf32>
    %5 = vector.shape_cast %4 : vector<1x1x512xf32> to vector<1x512xf32>
    %6 = vector.broadcast %5 : vector<1x512xf32> to vector<4x512xf32>
    %7 = arith.mulf %3, %6 : vector<4x512xf32>
    %c0_4 = arith.constant 0 : index
    %c0_5 = arith.constant 0 : index
    %c0_6 = arith.constant 0 : index
    %8 = vector.load %arg2[%c0_4, %c0_5, %c0_6] : memref<9x8x4xf32, #tpu.memory_space<vmem>>, vector<1x8x4xf32>
    %9 = vector.shape_cast %8 : vector<1x8x4xf32> to vector<8x4xf32>
    %cst = arith.constant dense<0.000000e+00> : vector<8x512xf32>
    %10 = tpu.matmul %9, %7, %cst {dimension_numbers = #tpu.dot_dimension_numbers<[1], [0], [0], [1], [0, 0, 1, 1], [], []>} : vector<8x4xf32>, vector<4x512xf32>, vector<8x512xf32> -> vector<8x512xf32>
    %11 = vector.extract_strided_slice %0 {offsets = [0, 496], sizes = [4, 16], strides = [1, 1]} : vector<4x512xf32> to vector<4x16xf32>
    %12 = vector.extract_strided_slice %0 {offsets = [0, 0], sizes = [4, 496], strides = [1, 1]} : vector<4x512xf32> to vector<4x496xf32>
    %13 = tpu.concatenate %11, %12 in 1 : vector<4x16xf32>, vector<4x496xf32> -> vector<4x512xf32>
    %c1 = arith.constant 1 : index
    %c0_7 = arith.constant 0 : index
    %c0_8 = arith.constant 0 : index
    %14 = vector.load %arg4[%c1, %c0_7, %c0_8] : memref<9x1x512xf32, #tpu.memory_space<vmem>>, vector<1x1x512xf32>
    %15 = vector.shape_cast %14 : vector<1x1x512xf32> to vector<1x512xf32>
    %16 = vector.broadcast %15 : vector<1x512xf32> to vector<4x512xf32>
    %17 = arith.mulf %13, %16 : vector<4x512xf32>
    %c1_9 = arith.constant 1 : index
    %c0_10 = arith.constant 0 : index
    %c0_11 = arith.constant 0 : index
    %18 = vector.load %arg2[%c1_9, %c0_10, %c0_11] : memref<9x8x4xf32, #tpu.memory_space<vmem>>, vector<1x8x4xf32>
    %19 = vector.shape_cast %18 : vector<1x8x4xf32> to vector<8x4xf32>
    %cst_12 = arith.constant dense<0.000000e+00> : vector<8x512xf32>
    %20 = tpu.matmul %19, %17, %cst_12 {dimension_numbers = #tpu.dot_dimension_numbers<[1], [0], [0], [1], [0, 0, 1, 1], [], []>} : vector<8x4xf32>, vector<4x512xf32>, vector<8x512xf32> -> vector<8x512xf32>
    %21 = arith.addf %10, %20 : vector<8x512xf32>
    %22 = vector.extract_strided_slice %0 {offsets = [0, 497], sizes = [4, 15], strides = [1, 1]} : vector<4x512xf32> to vector<4x15xf32>
    %23 = vector.extract_strided_slice %0 {offsets = [0, 0], sizes = [4, 497], strides = [1, 1]} : vector<4x512xf32> to vector<4x497xf32>
    %24 = tpu.concatenate %22, %23 in 1 : vector<4x15xf32>, vector<4x497xf32> -> vector<4x512xf32>
    %c2 = arith.constant 2 : index
    %c0_13 = arith.constant 0 : index
    %c0_14 = arith.constant 0 : index
    %25 = vector.load %arg4[%c2, %c0_13, %c0_14] : memref<9x1x512xf32, #tpu.memory_space<vmem>>, vector<1x1x512xf32>
    %26 = vector.shape_cast %25 : vector<1x1x512xf32> to vector<1x512xf32>
    %27 = vector.broadcast %26 : vector<1x512xf32> to vector<4x512xf32>
    %28 = arith.mulf %24, %27 : vector<4x512xf32>
    %c2_15 = arith.constant 2 : index
    %c0_16 = arith.constant 0 : index
    %c0_17 = arith.constant 0 : index
    %29 = vector.load %arg2[%c2_15, %c0_16, %c0_17] : memref<9x8x4xf32, #tpu.memory_space<vmem>>, vector<1x8x4xf32>
    %30 = vector.shape_cast %29 : vector<1x8x4xf32> to vector<8x4xf32>
    %cst_18 = arith.constant dense<0.000000e+00> : vector<8x512xf32>
    %31 = tpu.matmul %30, %28, %cst_18 {dimension_numbers = #tpu.dot_dimension_numbers<[1], [0], [0], [1], [0, 0, 1, 1], [], []>} : vector<8x4xf32>, vector<4x512xf32>, vector<8x512xf32> -> vector<8x512xf32>
    %32 = arith.addf %21, %31 : vector<8x512xf32>
    %33 = vector.extract_strided_slice %0 {offsets = [0, 511], sizes = [4, 1], strides = [1, 1]} : vector<4x512xf32> to vector<4x1xf32>
    %34 = vector.extract_strided_slice %0 {offsets = [0, 0], sizes = [4, 511], strides = [1, 1]} : vector<4x512xf32> to vector<4x511xf32>
    %35 = tpu.concatenate %33, %34 in 1 : vector<4x1xf32>, vector<4x511xf32> -> vector<4x512xf32>
    %c3 = arith.constant 3 : index
    %c0_19 = arith.constant 0 : index
    %c0_20 = arith.constant 0 : index
    %36 = vector.load %arg4[%c3, %c0_19, %c0_20] : memref<9x1x512xf32, #tpu.memory_space<vmem>>, vector<1x1x512xf32>
    %37 = vector.shape_cast %36 : vector<1x1x512xf32> to vector<1x512xf32>
    %38 = vector.broadcast %37 : vector<1x512xf32> to vector<4x512xf32>
    %39 = arith.mulf %35, %38 : vector<4x512xf32>
    %c3_21 = arith.constant 3 : index
    %c0_22 = arith.constant 0 : index
    %c0_23 = arith.constant 0 : index
    %40 = vector.load %arg2[%c3_21, %c0_22, %c0_23] : memref<9x8x4xf32, #tpu.memory_space<vmem>>, vector<1x8x4xf32>
    %41 = vector.shape_cast %40 : vector<1x8x4xf32> to vector<8x4xf32>
    %cst_24 = arith.constant dense<0.000000e+00> : vector<8x512xf32>
    %42 = tpu.matmul %41, %39, %cst_24 {dimension_numbers = #tpu.dot_dimension_numbers<[1], [0], [0], [1], [0, 0, 1, 1], [], []>} : vector<8x4xf32>, vector<4x512xf32>, vector<8x512xf32> -> vector<8x512xf32>
    %43 = arith.addf %32, %42 : vector<8x512xf32>
    %c4 = arith.constant 4 : index
    %c0_25 = arith.constant 0 : index
    %c0_26 = arith.constant 0 : index
    %44 = vector.load %arg4[%c4, %c0_25, %c0_26] : memref<9x1x512xf32, #tpu.memory_space<vmem>>, vector<1x1x512xf32>
    %45 = vector.shape_cast %44 : vector<1x1x512xf32> to vector<1x512xf32>
    %46 = vector.broadcast %45 : vector<1x512xf32> to vector<4x512xf32>
    %47 = arith.mulf %0, %46 : vector<4x512xf32>
    %c4_27 = arith.constant 4 : index
    %c0_28 = arith.constant 0 : index
    %c0_29 = arith.constant 0 : index
    %48 = vector.load %arg2[%c4_27, %c0_28, %c0_29] : memref<9x8x4xf32, #tpu.memory_space<vmem>>, vector<1x8x4xf32>
    %49 = vector.shape_cast %48 : vector<1x8x4xf32> to vector<8x4xf32>
    %cst_30 = arith.constant dense<0.000000e+00> : vector<8x512xf32>
    %50 = tpu.matmul %49, %47, %cst_30 {dimension_numbers = #tpu.dot_dimension_numbers<[1], [0], [0], [1], [0, 0, 1, 1], [], []>} : vector<8x4xf32>, vector<4x512xf32>, vector<8x512xf32> -> vector<8x512xf32>
    %51 = arith.addf %43, %50 : vector<8x512xf32>
    %52 = vector.extract_strided_slice %0 {offsets = [0, 1], sizes = [4, 511], strides = [1, 1]} : vector<4x512xf32> to vector<4x511xf32>
    %53 = vector.extract_strided_slice %0 {offsets = [0, 0], sizes = [4, 1], strides = [1, 1]} : vector<4x512xf32> to vector<4x1xf32>
    %54 = tpu.concatenate %52, %53 in 1 : vector<4x511xf32>, vector<4x1xf32> -> vector<4x512xf32>
    %c5 = arith.constant 5 : index
    %c0_31 = arith.constant 0 : index
    %c0_32 = arith.constant 0 : index
    %55 = vector.load %arg4[%c5, %c0_31, %c0_32] : memref<9x1x512xf32, #tpu.memory_space<vmem>>, vector<1x1x512xf32>
    %56 = vector.shape_cast %55 : vector<1x1x512xf32> to vector<1x512xf32>
    %57 = vector.broadcast %56 : vector<1x512xf32> to vector<4x512xf32>
    %58 = arith.mulf %54, %57 : vector<4x512xf32>
    %c5_33 = arith.constant 5 : index
    %c0_34 = arith.constant 0 : index
    %c0_35 = arith.constant 0 : index
    %59 = vector.load %arg2[%c5_33, %c0_34, %c0_35] : memref<9x8x4xf32, #tpu.memory_space<vmem>>, vector<1x8x4xf32>
    %60 = vector.shape_cast %59 : vector<1x8x4xf32> to vector<8x4xf32>
    %cst_36 = arith.constant dense<0.000000e+00> : vector<8x512xf32>
    %61 = tpu.matmul %60, %58, %cst_36 {dimension_numbers = #tpu.dot_dimension_numbers<[1], [0], [0], [1], [0, 0, 1, 1], [], []>} : vector<8x4xf32>, vector<4x512xf32>, vector<8x512xf32> -> vector<8x512xf32>
    %62 = arith.addf %51, %61 : vector<8x512xf32>
    %63 = vector.extract_strided_slice %0 {offsets = [0, 15], sizes = [4, 497], strides = [1, 1]} : vector<4x512xf32> to vector<4x497xf32>
    %64 = vector.extract_strided_slice %0 {offsets = [0, 0], sizes = [4, 15], strides = [1, 1]} : vector<4x512xf32> to vector<4x15xf32>
    %65 = tpu.concatenate %63, %64 in 1 : vector<4x497xf32>, vector<4x15xf32> -> vector<4x512xf32>
    %c6 = arith.constant 6 : index
    %c0_37 = arith.constant 0 : index
    %c0_38 = arith.constant 0 : index
    %66 = vector.load %arg4[%c6, %c0_37, %c0_38] : memref<9x1x512xf32, #tpu.memory_space<vmem>>, vector<1x1x512xf32>
    %67 = vector.shape_cast %66 : vector<1x1x512xf32> to vector<1x512xf32>
    %68 = vector.broadcast %67 : vector<1x512xf32> to vector<4x512xf32>
    %69 = arith.mulf %65, %68 : vector<4x512xf32>
    %c6_39 = arith.constant 6 : index
    %c0_40 = arith.constant 0 : index
    %c0_41 = arith.constant 0 : index
    %70 = vector.load %arg2[%c6_39, %c0_40, %c0_41] : memref<9x8x4xf32, #tpu.memory_space<vmem>>, vector<1x8x4xf32>
    %71 = vector.shape_cast %70 : vector<1x8x4xf32> to vector<8x4xf32>
    %cst_42 = arith.constant dense<0.000000e+00> : vector<8x512xf32>
    %72 = tpu.matmul %71, %69, %cst_42 {dimension_numbers = #tpu.dot_dimension_numbers<[1], [0], [0], [1], [0, 0, 1, 1], [], []>} : vector<8x4xf32>, vector<4x512xf32>, vector<8x512xf32> -> vector<8x512xf32>
    %73 = arith.addf %62, %72 : vector<8x512xf32>
    %74 = vector.extract_strided_slice %0 {offsets = [0, 16], sizes = [4, 496], strides = [1, 1]} : vector<4x512xf32> to vector<4x496xf32>
    %75 = vector.extract_strided_slice %0 {offsets = [0, 0], sizes = [4, 16], strides = [1, 1]} : vector<4x512xf32> to vector<4x16xf32>
    %76 = tpu.concatenate %74, %75 in 1 : vector<4x496xf32>, vector<4x16xf32> -> vector<4x512xf32>
    %c7 = arith.constant 7 : index
    %c0_43 = arith.constant 0 : index
    %c0_44 = arith.constant 0 : index
    %77 = vector.load %arg4[%c7, %c0_43, %c0_44] : memref<9x1x512xf32, #tpu.memory_space<vmem>>, vector<1x1x512xf32>
    %78 = vector.shape_cast %77 : vector<1x1x512xf32> to vector<1x512xf32>
    %79 = vector.broadcast %78 : vector<1x512xf32> to vector<4x512xf32>
    %80 = arith.mulf %76, %79 : vector<4x512xf32>
    %c7_45 = arith.constant 7 : index
    %c0_46 = arith.constant 0 : index
    %c0_47 = arith.constant 0 : index
    %81 = vector.load %arg2[%c7_45, %c0_46, %c0_47] : memref<9x8x4xf32, #tpu.memory_space<vmem>>, vector<1x8x4xf32>
    %82 = vector.shape_cast %81 : vector<1x8x4xf32> to vector<8x4xf32>
    %cst_48 = arith.constant dense<0.000000e+00> : vector<8x512xf32>
    %83 = tpu.matmul %82, %80, %cst_48 {dimension_numbers = #tpu.dot_dimension_numbers<[1], [0], [0], [1], [0, 0, 1, 1], [], []>} : vector<8x4xf32>, vector<4x512xf32>, vector<8x512xf32> -> vector<8x512xf32>
    %84 = arith.addf %73, %83 : vector<8x512xf32>
    %85 = vector.extract_strided_slice %0 {offsets = [0, 17], sizes = [4, 495], strides = [1, 1]} : vector<4x512xf32> to vector<4x495xf32>
    %86 = vector.extract_strided_slice %0 {offsets = [0, 0], sizes = [4, 17], strides = [1, 1]} : vector<4x512xf32> to vector<4x17xf32>
    %87 = tpu.concatenate %85, %86 in 1 : vector<4x495xf32>, vector<4x17xf32> -> vector<4x512xf32>
    %c8 = arith.constant 8 : index
    %c0_49 = arith.constant 0 : index
    %c0_50 = arith.constant 0 : index
    %88 = vector.load %arg4[%c8, %c0_49, %c0_50] : memref<9x1x512xf32, #tpu.memory_space<vmem>>, vector<1x1x512xf32>
    %89 = vector.shape_cast %88 : vector<1x1x512xf32> to vector<1x512xf32>
    %90 = vector.broadcast %89 : vector<1x512xf32> to vector<4x512xf32>
    %91 = arith.mulf %87, %90 : vector<4x512xf32>
    %c8_51 = arith.constant 8 : index
    %c0_52 = arith.constant 0 : index
    %c0_53 = arith.constant 0 : index
    %92 = vector.load %arg2[%c8_51, %c0_52, %c0_53] : memref<9x8x4xf32, #tpu.memory_space<vmem>>, vector<1x8x4xf32>
    %93 = vector.shape_cast %92 : vector<1x8x4xf32> to vector<8x4xf32>
    %cst_54 = arith.constant dense<0.000000e+00> : vector<8x512xf32>
    %94 = tpu.matmul %93, %91, %cst_54 {dimension_numbers = #tpu.dot_dimension_numbers<[1], [0], [0], [1], [0, 0, 1, 1], [], []>} : vector<8x4xf32>, vector<4x512xf32>, vector<8x512xf32> -> vector<8x512xf32>
    %95 = arith.addf %84, %94 : vector<8x512xf32>
    %c0_55 = arith.constant 0 : index
    %c0_56 = arith.constant 0 : index
    %96 = vector.load %arg3[%c0_55, %c0_56] : memref<8x1xf32, #tpu.memory_space<vmem>>, vector<8x1xf32>
    %97 = vector.broadcast %96 : vector<8x1xf32> to vector<8x512xf32>
    %98 = arith.addf %95, %97 : vector<8x512xf32>
    %cst_57 = arith.constant 0.000000e+00 : f32
    %99 = vector.broadcast %cst_57 : f32 to vector<8x512xf32>
    %100 = arith.maximumf %98, %99 : vector<8x512xf32>
    %c0_58 = arith.constant 0 : index
    %c0_59 = arith.constant 0 : index
    %101 = vector.load %arg13[%c0_58, %c0_59] : memref<8x512xf32, #tpu.memory_space<vmem>>, vector<8x512xf32>
    tpu.vector_store %arg13[%c0_58, %c0_59], %100 {strides = array<i32>} : memref<8x512xf32, #tpu.memory_space<vmem>>, vector<8x512xf32>,
    %102 = vector.extract_strided_slice %100 {offsets = [0, 1], sizes = [8, 511], strides = [1, 1]} : vector<8x512xf32> to vector<8x511xf32>
    %103 = vector.extract_strided_slice %100 {offsets = [0, 0], sizes = [8, 1], strides = [1, 1]} : vector<8x512xf32> to vector<8x1xf32>
    %104 = tpu.concatenate %102, %103 in 1 : vector<8x511xf32>, vector<8x1xf32> -> vector<8x512xf32>
    %105 = arith.maximumf %100, %104 : vector<8x512xf32>
    %106 = vector.extract_strided_slice %105 {offsets = [0, 16], sizes = [8, 496], strides = [1, 1]} : vector<8x512xf32> to vector<8x496xf32>
    %107 = vector.extract_strided_slice %105 {offsets = [0, 0], sizes = [8, 16], strides = [1, 1]} : vector<8x512xf32> to vector<8x16xf32>
    %108 = tpu.concatenate %106, %107 in 1 : vector<8x496xf32>, vector<8x16xf32> -> vector<8x512xf32>
    %109 = arith.maximumf %105, %108 : vector<8x512xf32>
    %c0_60 = arith.constant 0 : index
    %c0_61 = arith.constant 0 : index
    %110 = vector.load %arg5[%c0_60, %c0_61] : memref<512x128xf32, #tpu.memory_space<vmem>>, vector<512x128xf32>
    %cst_62 = arith.constant dense<0.000000e+00> : vector<8x128xf32>
    %111 = tpu.matmul %109, %110, %cst_62 {dimension_numbers = #tpu.dot_dimension_numbers<[1], [0], [0], [1], [0, 0, 1, 1], [], []>} : vector<8x512xf32>, vector<512x128xf32>, vector<8x128xf32> -> vector<8x128xf32>
    %112 = vector.extract_strided_slice %111 {offsets = [0, 119], sizes = [8, 9], strides = [1, 1]} : vector<8x128xf32> to vector<8x9xf32>
    %113 = vector.extract_strided_slice %111 {offsets = [0, 0], sizes = [8, 119], strides = [1, 1]} : vector<8x128xf32> to vector<8x119xf32>
    %114 = tpu.concatenate %112, %113 in 1 : vector<8x9xf32>, vector<8x119xf32> -> vector<8x128xf32>
    %c0_63 = arith.constant 0 : index
    %c0_64 = arith.constant 0 : index
    %c0_65 = arith.constant 0 : index
    %115 = vector.load %arg8[%c0_63, %c0_64, %c0_65] : memref<9x1x128xf32, #tpu.memory_space<vmem>>, vector<1x1x128xf32>
    %116 = vector.shape_cast %115 : vector<1x1x128xf32> to vector<1x128xf32>
    %117 = vector.broadcast %116 : vector<1x128xf32> to vector<8x128xf32>
    %118 = arith.mulf %114, %117 : vector<8x128xf32>
    %c0_66 = arith.constant 0 : index
    %c0_67 = arith.constant 0 : index
    %c0_68 = arith.constant 0 : index
    %119 = vector.load %arg6[%c0_66, %c0_67, %c0_68] : memref<9x16x8xf32, #tpu.memory_space<vmem>>, vector<1x16x8xf32>
    %120 = vector.shape_cast %119 : vector<1x16x8xf32> to vector<16x8xf32>
    %cst_69 = arith.constant dense<0.000000e+00> : vector<16x128xf32>
    %121 = tpu.matmul %120, %118, %cst_69 {dimension_numbers = #tpu.dot_dimension_numbers<[1], [0], [0], [1], [0, 0, 1, 1], [], []>} : vector<16x8xf32>, vector<8x128xf32>, vector<16x128xf32> -> vector<16x128xf32>
    %122 = vector.extract_strided_slice %111 {offsets = [0, 120], sizes = [8, 8], strides = [1, 1]} : vector<8x128xf32> to vector<8x8xf32>
    %123 = vector.extract_strided_slice %111 {offsets = [0, 0], sizes = [8, 120], strides = [1, 1]} : vector<8x128xf32> to vector<8x120xf32>
    %124 = tpu.concatenate %122, %123 in 1 : vector<8x8xf32>, vector<8x120xf32> -> vector<8x128xf32>
    %c1_70 = arith.constant 1 : index
    %c0_71 = arith.constant 0 : index
    %c0_72 = arith.constant 0 : index
    %125 = vector.load %arg8[%c1_70, %c0_71, %c0_72] : memref<9x1x128xf32, #tpu.memory_space<vmem>>, vector<1x1x128xf32>
    %126 = vector.shape_cast %125 : vector<1x1x128xf32> to vector<1x128xf32>
    %127 = vector.broadcast %126 : vector<1x128xf32> to vector<8x128xf32>
    %128 = arith.mulf %124, %127 : vector<8x128xf32>
    %c1_73 = arith.constant 1 : index
    %c0_74 = arith.constant 0 : index
    %c0_75 = arith.constant 0 : index
    %129 = vector.load %arg6[%c1_73, %c0_74, %c0_75] : memref<9x16x8xf32, #tpu.memory_space<vmem>>, vector<1x16x8xf32>
    %130 = vector.shape_cast %129 : vector<1x16x8xf32> to vector<16x8xf32>
    %cst_76 = arith.constant dense<0.000000e+00> : vector<16x128xf32>
    %131 = tpu.matmul %130, %128, %cst_76 {dimension_numbers = #tpu.dot_dimension_numbers<[1], [0], [0], [1], [0, 0, 1, 1], [], []>} : vector<16x8xf32>, vector<8x128xf32>, vector<16x128xf32> -> vector<16x128xf32>
    %132 = arith.addf %121, %131 : vector<16x128xf32>
    %133 = vector.extract_strided_slice %111 {offsets = [0, 121], sizes = [8, 7], strides = [1, 1]} : vector<8x128xf32> to vector<8x7xf32>
    %134 = vector.extract_strided_slice %111 {offsets = [0, 0], sizes = [8, 121], strides = [1, 1]} : vector<8x128xf32> to vector<8x121xf32>
    %135 = tpu.concatenate %133, %134 in 1 : vector<8x7xf32>, vector<8x121xf32> -> vector<8x128xf32>
    %c2_77 = arith.constant 2 : index
    %c0_78 = arith.constant 0 : index
    %c0_79 = arith.constant 0 : index
    %136 = vector.load %arg8[%c2_77, %c0_78, %c0_79] : memref<9x1x128xf32, #tpu.memory_space<vmem>>, vector<1x1x128xf32>
    %137 = vector.shape_cast %136 : vector<1x1x128xf32> to vector<1x128xf32>
    %138 = vector.broadcast %137 : vector<1x128xf32> to vector<8x128xf32>
    %139 = arith.mulf %135, %138 : vector<8x128xf32>
    %c2_80 = arith.constant 2 : index
    %c0_81 = arith.constant 0 : index
    %c0_82 = arith.constant 0 : index
    %140 = vector.load %arg6[%c2_80, %c0_81, %c0_82] : memref<9x16x8xf32, #tpu.memory_space<vmem>>, vector<1x16x8xf32>
    %141 = vector.shape_cast %140 : vector<1x16x8xf32> to vector<16x8xf32>
    %cst_83 = arith.constant dense<0.000000e+00> : vector<16x128xf32>
    %142 = tpu.matmul %141, %139, %cst_83 {dimension_numbers = #tpu.dot_dimension_numbers<[1], [0], [0], [1], [0, 0, 1, 1], [], []>} : vector<16x8xf32>, vector<8x128xf32>, vector<16x128xf32> -> vector<16x128xf32>
    %143 = arith.addf %132, %142 : vector<16x128xf32>
    %144 = vector.extract_strided_slice %111 {offsets = [0, 127], sizes = [8, 1], strides = [1, 1]} : vector<8x128xf32> to vector<8x1xf32>
    %145 = vector.extract_strided_slice %111 {offsets = [0, 0], sizes = [8, 127], strides = [1, 1]} : vector<8x128xf32> to vector<8x127xf32>
    %146 = tpu.concatenate %144, %145 in 1 : vector<8x1xf32>, vector<8x127xf32> -> vector<8x128xf32>
    %c3_84 = arith.constant 3 : index
    %c0_85 = arith.constant 0 : index
    %c0_86 = arith.constant 0 : index
    %147 = vector.load %arg8[%c3_84, %c0_85, %c0_86] : memref<9x1x128xf32, #tpu.memory_space<vmem>>, vector<1x1x128xf32>
    %148 = vector.shape_cast %147 : vector<1x1x128xf32> to vector<1x128xf32>
    %149 = vector.broadcast %148 : vector<1x128xf32> to vector<8x128xf32>
    %150 = arith.mulf %146, %149 : vector<8x128xf32>
    %c3_87 = arith.constant 3 : index
    %c0_88 = arith.constant 0 : index
    %c0_89 = arith.constant 0 : index
    %151 = vector.load %arg6[%c3_87, %c0_88, %c0_89] : memref<9x16x8xf32, #tpu.memory_space<vmem>>, vector<1x16x8xf32>
    %152 = vector.shape_cast %151 : vector<1x16x8xf32> to vector<16x8xf32>
    %cst_90 = arith.constant dense<0.000000e+00> : vector<16x128xf32>
    %153 = tpu.matmul %152, %150, %cst_90 {dimension_numbers = #tpu.dot_dimension_numbers<[1], [0], [0], [1], [0, 0, 1, 1], [], []>} : vector<16x8xf32>, vector<8x128xf32>, vector<16x128xf32> -> vector<16x128xf32>
    %154 = arith.addf %143, %153 : vector<16x128xf32>
    %c4_91 = arith.constant 4 : index
    %c0_92 = arith.constant 0 : index
    %c0_93 = arith.constant 0 : index
    %155 = vector.load %arg8[%c4_91, %c0_92, %c0_93] : memref<9x1x128xf32, #tpu.memory_space<vmem>>, vector<1x1x128xf32>
    %156 = vector.shape_cast %155 : vector<1x1x128xf32> to vector<1x128xf32>
    %157 = vector.broadcast %156 : vector<1x128xf32> to vector<8x128xf32>
    %158 = arith.mulf %111, %157 : vector<8x128xf32>
    %c4_94 = arith.constant 4 : index
    %c0_95 = arith.constant 0 : index
    %c0_96 = arith.constant 0 : index
    %159 = vector.load %arg6[%c4_94, %c0_95, %c0_96] : memref<9x16x8xf32, #tpu.memory_space<vmem>>, vector<1x16x8xf32>
    %160 = vector.shape_cast %159 : vector<1x16x8xf32> to vector<16x8xf32>
    %cst_97 = arith.constant dense<0.000000e+00> : vector<16x128xf32>
    %161 = tpu.matmul %160, %158, %cst_97 {dimension_numbers = #tpu.dot_dimension_numbers<[1], [0], [0], [1], [0, 0, 1, 1], [], []>} : vector<16x8xf32>, vector<8x128xf32>, vector<16x128xf32> -> vector<16x128xf32>
    %162 = arith.addf %154, %161 : vector<16x128xf32>
    %163 = vector.extract_strided_slice %111 {offsets = [0, 1], sizes = [8, 127], strides = [1, 1]} : vector<8x128xf32> to vector<8x127xf32>
    %164 = vector.extract_strided_slice %111 {offsets = [0, 0], sizes = [8, 1], strides = [1, 1]} : vector<8x128xf32> to vector<8x1xf32>
    %165 = tpu.concatenate %163, %164 in 1 : vector<8x127xf32>, vector<8x1xf32> -> vector<8x128xf32>
    %c5_98 = arith.constant 5 : index
    %c0_99 = arith.constant 0 : index
    %c0_100 = arith.constant 0 : index
    %166 = vector.load %arg8[%c5_98, %c0_99, %c0_100] : memref<9x1x128xf32, #tpu.memory_space<vmem>>, vector<1x1x128xf32>
    %167 = vector.shape_cast %166 : vector<1x1x128xf32> to vector<1x128xf32>
    %168 = vector.broadcast %167 : vector<1x128xf32> to vector<8x128xf32>
    %169 = arith.mulf %165, %168 : vector<8x128xf32>
    %c5_101 = arith.constant 5 : index
    %c0_102 = arith.constant 0 : index
    %c0_103 = arith.constant 0 : index
    %170 = vector.load %arg6[%c5_101, %c0_102, %c0_103] : memref<9x16x8xf32, #tpu.memory_space<vmem>>, vector<1x16x8xf32>
    %171 = vector.shape_cast %170 : vector<1x16x8xf32> to vector<16x8xf32>
    %cst_104 = arith.constant dense<0.000000e+00> : vector<16x128xf32>
    %172 = tpu.matmul %171, %169, %cst_104 {dimension_numbers = #tpu.dot_dimension_numbers<[1], [0], [0], [1], [0, 0, 1, 1], [], []>} : vector<16x8xf32>, vector<8x128xf32>, vector<16x128xf32> -> vector<16x128xf32>
    %173 = arith.addf %162, %172 : vector<16x128xf32>
    %174 = vector.extract_strided_slice %111 {offsets = [0, 7], sizes = [8, 121], strides = [1, 1]} : vector<8x128xf32> to vector<8x121xf32>
    %175 = vector.extract_strided_slice %111 {offsets = [0, 0], sizes = [8, 7], strides = [1, 1]} : vector<8x128xf32> to vector<8x7xf32>
    %176 = tpu.concatenate %174, %175 in 1 : vector<8x121xf32>, vector<8x7xf32> -> vector<8x128xf32>
    %c6_105 = arith.constant 6 : index
    %c0_106 = arith.constant 0 : index
    %c0_107 = arith.constant 0 : index
    %177 = vector.load %arg8[%c6_105, %c0_106, %c0_107] : memref<9x1x128xf32, #tpu.memory_space<vmem>>, vector<1x1x128xf32>
    %178 = vector.shape_cast %177 : vector<1x1x128xf32> to vector<1x128xf32>
    %179 = vector.broadcast %178 : vector<1x128xf32> to vector<8x128xf32>
    %180 = arith.mulf %176, %179 : vector<8x128xf32>
    %c6_108 = arith.constant 6 : index
    %c0_109 = arith.constant 0 : index
    %c0_110 = arith.constant 0 : index
    %181 = vector.load %arg6[%c6_108, %c0_109, %c0_110] : memref<9x16x8xf32, #tpu.memory_space<vmem>>, vector<1x16x8xf32>
    %182 = vector.shape_cast %181 : vector<1x16x8xf32> to vector<16x8xf32>
    %cst_111 = arith.constant dense<0.000000e+00> : vector<16x128xf32>
    %183 = tpu.matmul %182, %180, %cst_111 {dimension_numbers = #tpu.dot_dimension_numbers<[1], [0], [0], [1], [0, 0, 1, 1], [], []>} : vector<16x8xf32>, vector<8x128xf32>, vector<16x128xf32> -> vector<16x128xf32>
    %184 = arith.addf %173, %183 : vector<16x128xf32>
    %185 = vector.extract_strided_slice %111 {offsets = [0, 8], sizes = [8, 120], strides = [1, 1]} : vector<8x128xf32> to vector<8x120xf32>
    %186 = vector.extract_strided_slice %111 {offsets = [0, 0], sizes = [8, 8], strides = [1, 1]} : vector<8x128xf32> to vector<8x8xf32>
    %187 = tpu.concatenate %185, %186 in 1 : vector<8x120xf32>, vector<8x8xf32> -> vector<8x128xf32>
    %c7_112 = arith.constant 7 : index
    %c0_113 = arith.constant 0 : index
    %c0_114 = arith.constant 0 : index
    %188 = vector.load %arg8[%c7_112, %c0_113, %c0_114] : memref<9x1x128xf32, #tpu.memory_space<vmem>>, vector<1x1x128xf32>
    %189 = vector.shape_cast %188 : vector<1x1x128xf32> to vector<1x128xf32>
    %190 = vector.broadcast %189 : vector<1x128xf32> to vector<8x128xf32>
    %191 = arith.mulf %187, %190 : vector<8x128xf32>
    %c7_115 = arith.constant 7 : index
    %c0_116 = arith.constant 0 : index
    %c0_117 = arith.constant 0 : index
    %192 = vector.load %arg6[%c7_115, %c0_116, %c0_117] : memref<9x16x8xf32, #tpu.memory_space<vmem>>, vector<1x16x8xf32>
    %193 = vector.shape_cast %192 : vector<1x16x8xf32> to vector<16x8xf32>
    %cst_118 = arith.constant dense<0.000000e+00> : vector<16x128xf32>
    %194 = tpu.matmul %193, %191, %cst_118 {dimension_numbers = #tpu.dot_dimension_numbers<[1], [0], [0], [1], [0, 0, 1, 1], [], []>} : vector<16x8xf32>, vector<8x128xf32>, vector<16x128xf32> -> vector<16x128xf32>
    %195 = arith.addf %184, %194 : vector<16x128xf32>
    %196 = vector.extract_strided_slice %111 {offsets = [0, 9], sizes = [8, 119], strides = [1, 1]} : vector<8x128xf32> to vector<8x119xf32>
    %197 = vector.extract_strided_slice %111 {offsets = [0, 0], sizes = [8, 9], strides = [1, 1]} : vector<8x128xf32> to vector<8x9xf32>
    %198 = tpu.concatenate %196, %197 in 1 : vector<8x119xf32>, vector<8x9xf32> -> vector<8x128xf32>
    %c8_119 = arith.constant 8 : index
    %c0_120 = arith.constant 0 : index
    %c0_121 = arith.constant 0 : index
    %199 = vector.load %arg8[%c8_119, %c0_120, %c0_121] : memref<9x1x128xf32, #tpu.memory_space<vmem>>, vector<1x1x128xf32>
    %200 = vector.shape_cast %199 : vector<1x1x128xf32> to vector<1x128xf32>
    %201 = vector.broadcast %200 : vector<1x128xf32> to vector<8x128xf32>
    %202 = arith.mulf %198, %201 : vector<8x128xf32>
    %c8_122 = arith.constant 8 : index
    %c0_123 = arith.constant 0 : index
    %c0_124 = arith.constant 0 : index
    %203 = vector.load %arg6[%c8_122, %c0_123, %c0_124] : memref<9x16x8xf32, #tpu.memory_space<vmem>>, vector<1x16x8xf32>
    %204 = vector.shape_cast %203 : vector<1x16x8xf32> to vector<16x8xf32>
    %cst_125 = arith.constant dense<0.000000e+00> : vector<16x128xf32>
    %205 = tpu.matmul %204, %202, %cst_125 {dimension_numbers = #tpu.dot_dimension_numbers<[1], [0], [0], [1], [0, 0, 1, 1], [], []>} : vector<16x8xf32>, vector<8x128xf32>, vector<16x128xf32> -> vector<16x128xf32>
    %206 = arith.addf %195, %205 : vector<16x128xf32>
    %c0_126 = arith.constant 0 : index
    %c0_127 = arith.constant 0 : index
    %207 = vector.load %arg7[%c0_126, %c0_127] : memref<16x1xf32, #tpu.memory_space<vmem>>, vector<16x1xf32>
    %208 = vector.broadcast %207 : vector<16x1xf32> to vector<16x128xf32>
    %209 = arith.addf %206, %208 : vector<16x128xf32>
    %cst_128 = arith.constant 0.000000e+00 : f32
    %210 = vector.broadcast %cst_128 : f32 to vector<16x128xf32>
    %211 = arith.maximumf %209, %210 : vector<16x128xf32>
    %212 = vector.extract_strided_slice %211 {offsets = [0, 1], sizes = [16, 127], strides = [1, 1]} : vector<16x128xf32> to vector<16x127xf32>
    %213 = vector.extract_strided_slice %211 {offsets = [0, 0], sizes = [16, 1], strides = [1, 1]} : vector<16x128xf32> to vector<16x1xf32>
    %214 = tpu.concatenate %212, %213 in 1 : vector<16x127xf32>, vector<16x1xf32> -> vector<16x128xf32>
    %215 = arith.maximumf %211, %214 : vector<16x128xf32>
    %216 = vector.extract_strided_slice %215 {offsets = [0, 8], sizes = [16, 120], strides = [1, 1]} : vector<16x128xf32> to vector<16x120xf32>
    %217 = vector.extract_strided_slice %215 {offsets = [0, 0], sizes = [16, 8], strides = [1, 1]} : vector<16x128xf32> to vector<16x8xf32>
    %218 = tpu.concatenate %216, %217 in 1 : vector<16x120xf32>, vector<16x8xf32> -> vector<16x128xf32>
    %219 = arith.maximumf %215, %218 : vector<16x128xf32>
    %c0_129 = arith.constant 0 : index
    %c0_130 = arith.constant 0 : index
    %220 = vector.load %arg9[%c0_129, %c0_130] : memref<128x32xf32, #tpu.memory_space<vmem>>, vector<128x32xf32>
    %cst_131 = arith.constant dense<0.000000e+00> : vector<16x32xf32>
    %221 = tpu.matmul %219, %220, %cst_131 {dimension_numbers = #tpu.dot_dimension_numbers<[1], [0], [0], [1], [0, 0, 1, 1], [], []>} : vector<16x128xf32>, vector<128x32xf32>, vector<16x32xf32> -> vector<16x32xf32>
    %c0_132 = arith.constant 0 : index
    %c0_133 = arith.constant 0 : index
    %222 = vector.load %arg14[%c0_132, %c0_133] : memref<16x32xf32, #tpu.memory_space<vmem>>, vector<16x32xf32>
    tpu.vector_store %arg14[%c0_132, %c0_133], %221 {strides = array<i32>} : memref<16x32xf32, #tpu.memory_space<vmem>>, vector<16x32xf32>,
    %c0_134 = arith.constant 0 : index
    %c0_135 = arith.constant 0 : index
    %c0_136 = arith.constant 0 : index
    %223 = vector.load %arg10[%c0_134, %c0_135, %c0_136] : memref<16x32x32xf32, #tpu.memory_space<vmem>>, vector<1x32x32xf32>
    %224 = vector.shape_cast %223 : vector<1x32x32xf32> to vector<32x32xf32>
    %225 = vector.extract_strided_slice %221 {offsets = [0, 0], sizes = [1, 32], strides = [1, 1]} : vector<16x32xf32> to vector<1x32xf32>
    %226 = vector.broadcast %225 : vector<1x32xf32> to vector<32x32xf32>
    %227 = arith.mulf %224, %226 : vector<32x32xf32>
    %c1_137 = arith.constant 1 : index
    %c0_138 = arith.constant 0 : index
    %c0_139 = arith.constant 0 : index
    %228 = vector.load %arg10[%c1_137, %c0_138, %c0_139] : memref<16x32x32xf32, #tpu.memory_space<vmem>>, vector<1x32x32xf32>
    %229 = vector.shape_cast %228 : vector<1x32x32xf32> to vector<32x32xf32>
    %230 = vector.extract_strided_slice %221 {offsets = [1, 0], sizes = [1, 32], strides = [1, 1]} : vector<16x32xf32> to vector<1x32xf32>
    %231 = vector.broadcast %230 : vector<1x32xf32> to vector<32x32xf32>
    %232 = arith.mulf %229, %231 : vector<32x32xf32>
    %233 = arith.addf %227, %232 : vector<32x32xf32>
    %c2_140 = arith.constant 2 : index
    %c0_141 = arith.constant 0 : index
    %c0_142 = arith.constant 0 : index
    %234 = vector.load %arg10[%c2_140, %c0_141, %c0_142] : memref<16x32x32xf32, #tpu.memory_space<vmem>>, vector<1x32x32xf32>
    %235 = vector.shape_cast %234 : vector<1x32x32xf32> to vector<32x32xf32>
    %236 = vector.extract_strided_slice %221 {offsets = [2, 0], sizes = [1, 32], strides = [1, 1]} : vector<16x32xf32> to vector<1x32xf32>
    %237 = vector.broadcast %236 : vector<1x32xf32> to vector<32x32xf32>
    %238 = arith.mulf %235, %237 : vector<32x32xf32>
    %239 = arith.addf %233, %238 : vector<32x32xf32>
    %c3_143 = arith.constant 3 : index
    %c0_144 = arith.constant 0 : index
    %c0_145 = arith.constant 0 : index
    %240 = vector.load %arg10[%c3_143, %c0_144, %c0_145] : memref<16x32x32xf32, #tpu.memory_space<vmem>>, vector<1x32x32xf32>
    %241 = vector.shape_cast %240 : vector<1x32x32xf32> to vector<32x32xf32>
    %242 = vector.extract_strided_slice %221 {offsets = [3, 0], sizes = [1, 32], strides = [1, 1]} : vector<16x32xf32> to vector<1x32xf32>
    %243 = vector.broadcast %242 : vector<1x32xf32> to vector<32x32xf32>
    %244 = arith.mulf %241, %243 : vector<32x32xf32>
    %245 = arith.addf %239, %244 : vector<32x32xf32>
    %c4_146 = arith.constant 4 : index
    %c0_147 = arith.constant 0 : index
    %c0_148 = arith.constant 0 : index
    %246 = vector.load %arg10[%c4_146, %c0_147, %c0_148] : memref<16x32x32xf32, #tpu.memory_space<vmem>>, vector<1x32x32xf32>
    %247 = vector.shape_cast %246 : vector<1x32x32xf32> to vector<32x32xf32>
    %248 = vector.extract_strided_slice %221 {offsets = [4, 0], sizes = [1, 32], strides = [1, 1]} : vector<16x32xf32> to vector<1x32xf32>
    %249 = vector.broadcast %248 : vector<1x32xf32> to vector<32x32xf32>
    %250 = arith.mulf %247, %249 : vector<32x32xf32>
    %251 = arith.addf %245, %250 : vector<32x32xf32>
    %c5_149 = arith.constant 5 : index
    %c0_150 = arith.constant 0 : index
    %c0_151 = arith.constant 0 : index
    %252 = vector.load %arg10[%c5_149, %c0_150, %c0_151] : memref<16x32x32xf32, #tpu.memory_space<vmem>>, vector<1x32x32xf32>
    %253 = vector.shape_cast %252 : vector<1x32x32xf32> to vector<32x32xf32>
    %254 = vector.extract_strided_slice %221 {offsets = [5, 0], sizes = [1, 32], strides = [1, 1]} : vector<16x32xf32> to vector<1x32xf32>
    %255 = vector.broadcast %254 : vector<1x32xf32> to vector<32x32xf32>
    %256 = arith.mulf %253, %255 : vector<32x32xf32>
    %257 = arith.addf %251, %256 : vector<32x32xf32>
    %c6_152 = arith.constant 6 : index
    %c0_153 = arith.constant 0 : index
    %c0_154 = arith.constant 0 : index
    %258 = vector.load %arg10[%c6_152, %c0_153, %c0_154] : memref<16x32x32xf32, #tpu.memory_space<vmem>>, vector<1x32x32xf32>
    %259 = vector.shape_cast %258 : vector<1x32x32xf32> to vector<32x32xf32>
    %260 = vector.extract_strided_slice %221 {offsets = [6, 0], sizes = [1, 32], strides = [1, 1]} : vector<16x32xf32> to vector<1x32xf32>
    %261 = vector.broadcast %260 : vector<1x32xf32> to vector<32x32xf32>
    %262 = arith.mulf %259, %261 : vector<32x32xf32>
    %263 = arith.addf %257, %262 : vector<32x32xf32>
    %c7_155 = arith.constant 7 : index
    %c0_156 = arith.constant 0 : index
    %c0_157 = arith.constant 0 : index
    %264 = vector.load %arg10[%c7_155, %c0_156, %c0_157] : memref<16x32x32xf32, #tpu.memory_space<vmem>>, vector<1x32x32xf32>
    %265 = vector.shape_cast %264 : vector<1x32x32xf32> to vector<32x32xf32>
    %266 = vector.extract_strided_slice %221 {offsets = [7, 0], sizes = [1, 32], strides = [1, 1]} : vector<16x32xf32> to vector<1x32xf32>
    %267 = vector.broadcast %266 : vector<1x32xf32> to vector<32x32xf32>
    %268 = arith.mulf %265, %267 : vector<32x32xf32>
    %269 = arith.addf %263, %268 : vector<32x32xf32>
    %c8_158 = arith.constant 8 : index
    %c0_159 = arith.constant 0 : index
    %c0_160 = arith.constant 0 : index
    %270 = vector.load %arg10[%c8_158, %c0_159, %c0_160] : memref<16x32x32xf32, #tpu.memory_space<vmem>>, vector<1x32x32xf32>
    %271 = vector.shape_cast %270 : vector<1x32x32xf32> to vector<32x32xf32>
    %272 = vector.extract_strided_slice %221 {offsets = [8, 0], sizes = [1, 32], strides = [1, 1]} : vector<16x32xf32> to vector<1x32xf32>
    %273 = vector.broadcast %272 : vector<1x32xf32> to vector<32x32xf32>
    %274 = arith.mulf %271, %273 : vector<32x32xf32>
    %275 = arith.addf %269, %274 : vector<32x32xf32>
    %c9 = arith.constant 9 : index
    %c0_161 = arith.constant 0 : index
    %c0_162 = arith.constant 0 : index
    %276 = vector.load %arg10[%c9, %c0_161, %c0_162] : memref<16x32x32xf32, #tpu.memory_space<vmem>>, vector<1x32x32xf32>
    %277 = vector.shape_cast %276 : vector<1x32x32xf32> to vector<32x32xf32>
    %278 = vector.extract_strided_slice %221 {offsets = [9, 0], sizes = [1, 32], strides = [1, 1]} : vector<16x32xf32> to vector<1x32xf32>
    %279 = vector.broadcast %278 : vector<1x32xf32> to vector<32x32xf32>
    %280 = arith.mulf %277, %279 : vector<32x32xf32>
    %281 = arith.addf %275, %280 : vector<32x32xf32>
    %c10 = arith.constant 10 : index
    %c0_163 = arith.constant 0 : index
    %c0_164 = arith.constant 0 : index
    %282 = vector.load %arg10[%c10, %c0_163, %c0_164] : memref<16x32x32xf32, #tpu.memory_space<vmem>>, vector<1x32x32xf32>
    %283 = vector.shape_cast %282 : vector<1x32x32xf32> to vector<32x32xf32>
    %284 = vector.extract_strided_slice %221 {offsets = [10, 0], sizes = [1, 32], strides = [1, 1]} : vector<16x32xf32> to vector<1x32xf32>
    %285 = vector.broadcast %284 : vector<1x32xf32> to vector<32x32xf32>
    %286 = arith.mulf %283, %285 : vector<32x32xf32>
    %287 = arith.addf %281, %286 : vector<32x32xf32>
    %c11 = arith.constant 11 : index
    %c0_165 = arith.constant 0 : index
    %c0_166 = arith.constant 0 : index
    %288 = vector.load %arg10[%c11, %c0_165, %c0_166] : memref<16x32x32xf32, #tpu.memory_space<vmem>>, vector<1x32x32xf32>
    %289 = vector.shape_cast %288 : vector<1x32x32xf32> to vector<32x32xf32>
    %290 = vector.extract_strided_slice %221 {offsets = [11, 0], sizes = [1, 32], strides = [1, 1]} : vector<16x32xf32> to vector<1x32xf32>
    %291 = vector.broadcast %290 : vector<1x32xf32> to vector<32x32xf32>
    %292 = arith.mulf %289, %291 : vector<32x32xf32>
    %293 = arith.addf %287, %292 : vector<32x32xf32>
    %c12 = arith.constant 12 : index
    %c0_167 = arith.constant 0 : index
    %c0_168 = arith.constant 0 : index
    %294 = vector.load %arg10[%c12, %c0_167, %c0_168] : memref<16x32x32xf32, #tpu.memory_space<vmem>>, vector<1x32x32xf32>
    %295 = vector.shape_cast %294 : vector<1x32x32xf32> to vector<32x32xf32>
    %296 = vector.extract_strided_slice %221 {offsets = [12, 0], sizes = [1, 32], strides = [1, 1]} : vector<16x32xf32> to vector<1x32xf32>
    %297 = vector.broadcast %296 : vector<1x32xf32> to vector<32x32xf32>
    %298 = arith.mulf %295, %297 : vector<32x32xf32>
    %299 = arith.addf %293, %298 : vector<32x32xf32>
    %c13 = arith.constant 13 : index
    %c0_169 = arith.constant 0 : index
    %c0_170 = arith.constant 0 : index
    %300 = vector.load %arg10[%c13, %c0_169, %c0_170] : memref<16x32x32xf32, #tpu.memory_space<vmem>>, vector<1x32x32xf32>
    %301 = vector.shape_cast %300 : vector<1x32x32xf32> to vector<32x32xf32>
    %302 = vector.extract_strided_slice %221 {offsets = [13, 0], sizes = [1, 32], strides = [1, 1]} : vector<16x32xf32> to vector<1x32xf32>
    %303 = vector.broadcast %302 : vector<1x32xf32> to vector<32x32xf32>
    %304 = arith.mulf %301, %303 : vector<32x32xf32>
    %305 = arith.addf %299, %304 : vector<32x32xf32>
    %c14 = arith.constant 14 : index
    %c0_171 = arith.constant 0 : index
    %c0_172 = arith.constant 0 : index
    %306 = vector.load %arg10[%c14, %c0_171, %c0_172] : memref<16x32x32xf32, #tpu.memory_space<vmem>>, vector<1x32x32xf32>
    %307 = vector.shape_cast %306 : vector<1x32x32xf32> to vector<32x32xf32>
    %308 = vector.extract_strided_slice %221 {offsets = [14, 0], sizes = [1, 32], strides = [1, 1]} : vector<16x32xf32> to vector<1x32xf32>
    %309 = vector.broadcast %308 : vector<1x32xf32> to vector<32x32xf32>
    %310 = arith.mulf %307, %309 : vector<32x32xf32>
    %311 = arith.addf %305, %310 : vector<32x32xf32>
    %c15 = arith.constant 15 : index
    %c0_173 = arith.constant 0 : index
    %c0_174 = arith.constant 0 : index
    %312 = vector.load %arg10[%c15, %c0_173, %c0_174] : memref<16x32x32xf32, #tpu.memory_space<vmem>>, vector<1x32x32xf32>
    %313 = vector.shape_cast %312 : vector<1x32x32xf32> to vector<32x32xf32>
    %314 = vector.extract_strided_slice %221 {offsets = [15, 0], sizes = [1, 32], strides = [1, 1]} : vector<16x32xf32> to vector<1x32xf32>
    %315 = vector.broadcast %314 : vector<1x32xf32> to vector<32x32xf32>
    %316 = arith.mulf %313, %315 : vector<32x32xf32>
    %317 = arith.addf %311, %316 : vector<32x32xf32>
    %c0_175 = arith.constant 0 : index
    %c0_176 = arith.constant 0 : index
    %318 = vector.load %arg11[%c0_175, %c0_176] : memref<32x2xf32, #tpu.memory_space<vmem>>, vector<32x2xf32>
    %cst_177 = arith.constant dense<0.000000e+00> : vector<32x2xf32>
    %319 = tpu.matmul %317, %318, %cst_177 {dimension_numbers = #tpu.dot_dimension_numbers<[1], [0], [0], [1], [0, 0, 1, 1], [], []>} : vector<32x32xf32>, vector<32x2xf32>, vector<32x2xf32> -> vector<32x2xf32>
    %c0_178 = arith.constant 0 : index
    %c0_179 = arith.constant 0 : index
    %320 = vector.load %arg12[%c0_178, %c0_179] : memref<32x1xf32, #tpu.memory_space<vmem>>, vector<32x1xf32>
    %321 = vector.broadcast %320 : vector<32x1xf32> to vector<32x2xf32>
    %322 = arith.addf %319, %321 : vector<32x2xf32>
    %c0_180 = arith.constant 0 : index
    %c0_181 = arith.constant 0 : index
    %323 = vector.load %arg15[%c0_180, %c0_181] : memref<32x2xf32, #tpu.memory_space<vmem>>, vector<32x2xf32>
    tpu.vector_store %arg15[%c0_180, %c0_181], %322 {strides = array<i32>} : memref<32x2xf32, #tpu.memory_space<vmem>>, vector<32x2xf32>,
    return
  }
  func.func @transform_0(%arg0: i32) -> (i32, i32) {
    %c0_i32 = arith.constant 0 : i32
    %c0_i32_0 = arith.constant 0 : i32
    %c0_i32_1 = arith.constant 0 : i32
    return %c0_i32, %c0_i32_0 : i32, i32
  }
  func.func @transform_1(%arg0: i32) -> (i32, i32, i32) {
    %c0_i32 = arith.constant 0 : i32
    %c0_i32_0 = arith.constant 0 : i32
    %c0_i32_1 = arith.constant 0 : i32
    %c0_i32_2 = arith.constant 0 : i32
    return %c0_i32, %c0_i32_0, %c0_i32_1 : i32, i32, i32
  }
  func.func @transform_2(%arg0: i32) -> (i32, i32) {
    %c0_i32 = arith.constant 0 : i32
    %c0_i32_0 = arith.constant 0 : i32
    %c0_i32_1 = arith.constant 0 : i32
    return %c0_i32, %c0_i32_0 : i32, i32
  }
  func.func @transform_3(%arg0: i32) -> (i32, i32, i32) {
    %c0_i32 = arith.constant 0 : i32
    %c0_i32_0 = arith.constant 0 : i32
    %c0_i32_1 = arith.constant 0 : i32
    %c0_i32_2 = arith.constant 0 : i32
    return %c0_i32, %c0_i32_0, %c0_i32_1 : i32, i32, i32
  }
  func.func @transform_4(%arg0: i32) -> (i32, i32) {
    %c0_i32 = arith.constant 0 : i32
    %c0_i32_0 = arith.constant 0 : i32
    %c0_i32_1 = arith.constant 0 : i32
    return %c0_i32, %c0_i32_0 : i32, i32
  }
  func.func @transform_5(%arg0: i32) -> (i32, i32, i32) {
    %c0_i32 = arith.constant 0 : i32
    %c0_i32_0 = arith.constant 0 : i32
    %c0_i32_1 = arith.constant 0 : i32
    %c0_i32_2 = arith.constant 0 : i32
    return %c0_i32, %c0_i32_0, %c0_i32_1 : i32, i32, i32
  }
  func.func @transform_6(%arg0: i32) -> (i32, i32) {
    %c0_i32 = arith.constant 0 : i32
    %c0_i32_0 = arith.constant 0 : i32
    %c0_i32_1 = arith.constant 0 : i32
    return %c0_i32, %c0_i32_0 : i32, i32
  }
  func.func @transform_7(%arg0: i32) -> (i32, i32, i32) {
    %c0_i32 = arith.constant 0 : i32
    %c0_i32_0 = arith.constant 0 : i32
    %c0_i32_1 = arith.constant 0 : i32
    %c0_i32_2 = arith.constant 0 : i32
    return %c0_i32, %c0_i32_0, %c0_i32_1 : i32, i32, i32
  }
  func.func @transform_8(%arg0: i32) -> (i32, i32) {
    %c0_i32 = arith.constant 0 : i32
    %c0_i32_0 = arith.constant 0 : i32
    %c0_i32_1 = arith.constant 0 : i32
    return %c0_i32, %c0_i32_0 : i32, i32
  }
  func.func @transform_9(%arg0: i32) -> (i32, i32, i32) {
    %c0_i32 = arith.constant 0 : i32
    %c0_i32_0 = arith.constant 0 : i32
    %c0_i32_1 = arith.constant 0 : i32
    %c0_i32_2 = arith.constant 0 : i32
    return %c0_i32, %c0_i32_0, %c0_i32_1 : i32, i32, i32
  }
  func.func @transform_10(%arg0: i32) -> (i32, i32) {
    %c0_i32 = arith.constant 0 : i32
    %c0_i32_0 = arith.constant 0 : i32
    %c0_i32_1 = arith.constant 0 : i32
    return %c0_i32, %c0_i32_0 : i32, i32
  }
  func.func @transform_11(%arg0: i32) -> (i32, i32) {
    %c0_i32 = arith.constant 0 : i32
    %c0_i32_0 = arith.constant 0 : i32
    %c0_i32_1 = arith.constant 0 : i32
    return %c0_i32, %c0_i32_0 : i32, i32
  }
  func.func @transform_12(%arg0: i32) -> (i32, i32) {
    %c0_i32 = arith.constant 0 : i32
    %c0_i32_0 = arith.constant 0 : i32
    %c0_i32_1 = arith.constant 0 : i32
    return %c0_i32, %c0_i32_0 : i32, i32
  }
  func.func @transform_13(%arg0: i32) -> (i32, i32) {
    %c0_i32 = arith.constant 0 : i32
    %c0_i32_0 = arith.constant 0 : i32
    %c0_i32_1 = arith.constant 0 : i32
    return %c0_i32, %c0_i32_0 : i32, i32
  }
  func.func @transform_14(%arg0: i32) -> (i32, i32) {
    %c0_i32 = arith.constant 0 : i32
    %c0_i32_0 = arith.constant 0 : i32
    %c0_i32_1 = arith.constant 0 : i32
    return %c0_i32, %c0_i32_0 : i32, i32
  }
}

</mosaic_0001>

<bundles_post_ra>
// kernel: forward.1
= control target key start
LH: loop header
LB: loop body
LE: loop exit
PB: predicated region body
PF: predicated region fallthrough
CT: control target
= control target key end

     0   :  { %20 = vsyncpa [#allocation3], 0  ;;  %s3468_s0 = inlined_call_operand.vmem [shape: f32[4,512], index: 0, kind: input, shape index: {}]   ;;  %s3469_s1 = inlined_call_operand.vmem [shape: f32[9,8,4], index: 1, kind: input, shape index: {}]   ;;  %s3470_s2 = inlined_call_operand.hbm [shape: f32[8,1], index: 2, kind: input, shape index: {}]   ;;  %s3471_s3 = inlined_call_operand.vmem [shape: f32[9,1,512], index: 3, kind: input, shape index: {}]   ;;  %s3472_s4 = inlined_call_operand.hbm [shape: f32[512,128], index: 4, kind: input, shape index: {}]   ;;  %s3473_s5 = inlined_call_operand.vmem [shape: f32[9,16,8], index: 5, kind: input, shape index: {}]   ;;  %s3474_s6 = inlined_call_operand.vmem [shape: f32[16,1], index: 6, kind: input, shape index: {}]   ;;  %s3475_s7 = inlined_call_operand.hbm [shape: f32[9,1,128], index: 7, kind: input, shape index: {}]   ;;  %s3476_s8 = inlined_call_operand.vmem [shape: f32[128,32], index: 8, kind: input, shape index: {}]   ;;  %s3477_s9 = inlined_call_operand.hbm [shape: f32[16,32,32], index: 9, kind: input, shape index: {}]   ;;  %s3478_s10 = inlined_call_operand.hbm [shape: f32[32,2], index: 10, kind: input, shape index: {}]   ;;  %s3479_s11 = inlined_call_operand.hbm [shape: f32[32,1], index: 11, kind: input, shape index: {}]   ;;  %s3480_s12 = inlined_call_operand.vmem [shape: f32[8,512], index: 12, kind: output, shape index: {0}]   ;;  %s3481_s13 = inlined_call_operand.vmem [shape: f32[16,32], index: 13, kind: output, shape index: {1}]   ;;  %s3482_s14 = inlined_call_operand.vmem [shape: f32[32,2], index: 14, kind: output, shape index: {2}]  }
   0x1   :  { %21 = vsyncpa [#allocation5], 0 }
   0x2   :  { %22 = vsyncpa [#allocation8], 0  ;;  %s45_s15 = sshll.u32 %s3472_s4, 4  ;;  %s46_s15 = int_to_ptr.hbm [resolvable:$true] %s45_s15 }
   0x3   :  { %23 = vsyncpa [#allocation11], 0  ;;  %s2724_s16 = smov [#allocation4]   ;;  %s77_s20 = sshll.u32 %s3477_s9, 4  ;;  %s78_s20 = int_to_ptr.hbm [resolvable:$true] %s77_s20 }
   0x4   :  { %s47_s17 = sshll.u32 %s2724_s16, 4  ;;  %s2725_s21 = smov 128   ;;  %s48_s17 = int_to_ptr.vmem [resolvable:$true] %s47_s17 }
   0x5   :  { %s2726_s22 = smov 8   ;;  %s2727_s23 = smov [#allocation7]  }
   0x6   :  { %53 = dma.hbm_to_vmem [thread:$0]  %s46_s15, 8192, %s48_s17, [#allocation5], %s2725_s21, %s2725_s21, %s2726_s22  }
   0x7   :  { %s79_s24 = sshll.u32 %s2727_s23, 4  ;;  %s33_s26 = sshll.u32 %s3470_s2, 4  ;;  %s80_s24 = int_to_ptr.vmem [resolvable:$true] %s79_s24  ;;  %s34_s26 = int_to_ptr.hbm [resolvable:$true] %s33_s26 }
   0x8   :  { %85 = dma.hbm_to_vmem [thread:$0]  %s78_s20, 8192, %s80_s24, [#allocation8], %s2725_s21, %s2725_s21, %s2726_s22  }
   0x9   :  { %s62_s28 = sshll.u32 %s3475_s7, 4  ;;  %s2728_s29 = smov [#allocation2]   ;;  %s63_s28 = int_to_ptr.hbm [resolvable:$true] %s62_s28 }
   0xa   :  { %s35_s30 = sshll.u32 %s2728_s29, 4  ;;  %s2729_s15 = smov [#allocation6]   ;;  %s36_s30 = int_to_ptr.vmem [resolvable:$true] %s35_s30 }
   0xb   :  { %38 = dma.hbm_to_vmem [thread:$0]  %s34_s26, 128, %s36_s30, [#allocation3]  }
   0xc   :  { %s64_s16 = sshll.u32 %s2729_s15, 4  ;;  %s2730_s17 = smov 16   ;;  %s65_s16 = int_to_ptr.vmem [resolvable:$true] %s64_s16 }
   0xd   :  { %s2731_s2 = smov 1   ;;  %s90_s20 = sshll.u32 %s3478_s10, 4  ;;  %s91_s20 = int_to_ptr.hbm [resolvable:$true] %s90_s20 }
   0xe   :  { %70 = dma.hbm_to_vmem [thread:$0]  %s63_s28, 144, %s65_s16, [#allocation5], %s2730_s17, %s2730_s17, %s2731_s2  }
   0xf   :  { %s2732_s7 = smov [#allocation9]   ;;  %s103_s4 = sshll.u32 %s3479_s11, 4  ;;  %s104_s4 = int_to_ptr.hbm [resolvable:$true] %s103_s4 }
  0x10   :  { %s92_s23 = sshll.u32 %s2732_s7, 4  ;;  %s2733_s26 = smov [#allocation10]   ;;  %s93_s23 = int_to_ptr.vmem [resolvable:$true] %s92_s23 }
  0x11   :  { %98 = dma.hbm_to_vmem [thread:$0]  %s91_s20, 512, %s93_s23, [#allocation8], %s2725_s21, %s2725_s21, %s2726_s22  }
  0x12   :  { %s105_s9 = sshll.u32 %s2733_s26, 4  ;;  %s106_s9 = int_to_ptr.vmem [resolvable:$true] %s105_s9 }
  0x13   :  { %111 = dma.hbm_to_vmem [thread:$0]  %s104_s4, 512, %s106_s9, [#allocation11], %s2725_s21, %s2725_s21, %s2726_s22  }
  0x14   :  { %2716 = dma.done.wait [#allocation3], 128  }
  0x15   :  { %2717 = vsyncadd [#allocation3], 4294967168 }
  0x16   :  { %2718 = dma.done.wait [#allocation5], 8336  }
  0x17   :  { %2719 = vsyncadd [#allocation5], 4294958960 }
  0x18   :  { %2720 = dma.done.wait [#allocation8], 8704  }
  0x19   :  { %2721 = vsyncadd [#allocation8], 4294958592 }
  0x1a   :  { %2722 = dma.done.wait [#allocation11], 512  }
  0x1b   :  { %2723 = vsyncadd [#allocation11], 4294966784  ;;  %v2857_v0 = vld [vmem:[%s3468_s0 + $0x8] sm:$0xff]  ;;  %v2864_v1 = vld [vmem:[%s3468_s0] sm:$0xff]  ;;  %s2734_s21 = smov 17   ;;  %vm234_vm0 = vcmask 1043456  }
  0x1c   :  { %147 = vst [vmem:[#allocation1 + $0x10] ss:$2 sm:$0xff] %v2857_v0  ;;  %v2871_v5 = vld [vmem:[%s3471_s3 + $0x10] sm:$0xf]  ;;  %s2735_s0 = smov 15   ;;  %s2736_s15 = smov 127  }
  0x1d   :  { %139 = vst [vmem:[#allocation1] ss:$2 sm:$0xff] %v2857_v0  ;;  %v718_v10 = vperm.slane %v2871_v5, 3  ;;  %v717_v11 = vperm.slane %v2871_v5, 2  ;;  %v716_v29 = vperm.slane %v2871_v5, 1  ;;  %v715_v30 = vperm.slane %v2871_v5, 0 }
  0x1e   :  { %s2737_s16 = smov 113   ;;  %vm160_vm1 = vcmask 138240   ;;  %v2943_v54 = vld [vmem:[%s3471_s3] sm:$0xf]  ;;  %s2739_s20 = smov 111   ;;  %vm204_vm2 = vcmask 130048  }
  0x1f   :  { %v720_v12 = vrot.slane %v718_v10, 4  ;;  %v719_v31 = vrot.slane %v716_v29, 4  ;;  %v173_v60 = vperm.slane %v2943_v54, 2  ;;  %vm230_vm3 = vcmask 31744   ;;  %s2743_s7 = smov 120   ;;  %s2744_s23 = smov 121  }
  0x20   :  { %vm587_vm4 = vcmask 7168   ;;  %vm442_vm5 = vcmask 121856   ;;  %vm848_vm6 = vcmask 1039360   ;;  %vm993_vm7 = vcmask 924672   ;;  %s2745_s24 = smov 119  }
  0x21   :  { %v722_v16 = vsel %vm234_vm0, %v717_v11, %v720_v12  ;;  %v721_v35 = vsel %vm234_vm0, %v715_v30, %v719_v31  ;;  %v172_v30 = vperm.slane %v2943_v54, 1  ;;  %vm1138_vm8 = vcmask 916480  }
  0x22   :  { %v726_v17 = vmul.f32 %v722_v16, %v2857_v0  ;;  %v725_v36 = vmul.f32 %v721_v35, %v2864_v1  ;;  %v2975_v16 = vld [vmem:[%s3471_s3 + $0xc] sm:$0xf]  ;;  %v171_v35 = vperm.slane %v2943_v54, 0  ;;  %vm1283_vm9 = vcmask 908288  }
  0x23   :  { %v151_v2 = vld.sshfl [vmem:[#allocation1 + $0x18] sm:$0xff pattern:$0x75316420]  ;;  %v150_v3 = vld.sshfl [vmem:[#allocation1 + $0x10] sm:$0xff pattern:$0x75316420] }
  0x24   :  { %158 = vrot.lane.b32.xlu1 %v151_v2, %s2734_s21  ;;  %156 = vrot.lane.b32.xlu0 %v150_v3, %s2734_s21  ;;  %191 = vst [vmem:[#allocation1 + $0x10] ss:$2 sm:$0xff] %v2857_v0  ;;  %v140_v4 = vld.sshfl [vmem:[#allocation1 + $0x8] sm:$0xff pattern:$0x75316420]  ;;  %vm1639_vm10 = vcmask 64512  }
  0x25   :  { %145 = vst [vmem:[#allocation1] ss:$2 sm:$0xff] %v2864_v1  ;;  %141 = vrot.lane.b32.xlu2 %v140_v4, %s2734_s21  ;;  %v2392_v4 = vld [vmem:[%s3471_s3 + $0x4] sm:$0xf]  ;;  %vm2080_vm11 = vcmask 261120   ;;  %vm2371_vm12 = vcmask 15360  }
  0x26   :  { %v218_v29 = vperm.slane %v2392_v4, 2 }
  0x2b   :  { %v194_v6 = vld.sshfl [vmem:[#allocation1 + $0x10] sm:$0xff pattern:$0x75316420]  ;;  %v195_v7 = vld.sshfl [vmem:[#allocation1 + $0x18] sm:$0xff pattern:$0x75316420] }
  0x2c   :  { %200 = vrot.lane.b32.xlu1 %v194_v6, %s2730_s17  ;;  %v148_v8 = vld.sshfl [vmem:[#allocation1] sm:$0xff pattern:$0x75316420]  ;;  %v149_v9 = vld.sshfl [vmem:[#allocation1 + $0x8] sm:$0xff pattern:$0x75316420] }
  0x2d   :  { %152 = vrot.lane.b32.xlu0 %v148_v8, %s2734_s21  ;;  %184 = vst [vmem:[#allocation1] ss:$2 sm:$0xff] %v2857_v0  ;;  %154 = vrot.lane.b32.xlu2 %v149_v9, %s2734_s21  ;;  %v174_v6 = vperm.slane %v2943_v54, 3  ;;  %v219_v8 = vperm.slane %v2392_v4, 3  ;;  %v2962_v9 = vld [vmem:[%s3469_s1] sm:$0xff] }
  0x2e   :  { %429 = vst [vmem:[#allocation1 + $0x10] ss:$2 sm:$0xff] %v2857_v0 }
  0x34   :  { %202 = vrot.lane.b32.xlu1 %v195_v7, %s2730_s17  ;;  %v185_v13 = vld.sshfl [vmem:[#allocation1 + $0x8] sm:$0xff pattern:$0x75316420] }
  0x35   :  { %v432_v14 = vld.sshfl [vmem:[#allocation1 + $0x10] sm:$0xff pattern:$0x75316420]  ;;  %v433_v15 = vld.sshfl [vmem:[#allocation1 + $0x18] sm:$0xff pattern:$0x75316420]  ;;  %186 = vrot.lane.b32.xlu0 %v185_v13, %s2730_s17 }
  0x36   :  { %574 = vst [vmem:[#allocation1 + $0x10] ss:$2 sm:$0xff] %v2857_v0  ;;  %438 = vrot.lane.b32.xlu2 %v432_v14, %s2735_s0 }
  0x37   :  { %189 = vst [vmem:[#allocation1] ss:$2 sm:$0xff] %v2864_v1 }
  0x3d   :  { %v578_v18 = vld.sshfl [vmem:[#allocation1 + $0x18] sm:$0xff pattern:$0x75316420]  ;;  %v577_v19 = vld.sshfl [vmem:[#allocation1 + $0x10] sm:$0xff pattern:$0x75316420]  ;;  %440 = vrot.lane.b32.xlu0 %v433_v15, %s2735_s0 }
  0x3e   :  { %583 = vrot.lane.b32.xlu1 %v577_v19, %s2731_s2  ;;  %733 = vst [vmem:[#allocation1 + $0x10] ss:$2 sm:$0xff] %v726_v17  ;;  %v192_v20 = vld.sshfl [vmem:[#allocation1] sm:$0xff pattern:$0x75316420]  ;;  %v2393_v15 = vld [vmem:[%s3469_s1 + $0x8] sm:$0xff] }
  0x3f   :  { %v193_v21 = vld.sshfl [vmem:[#allocation1 + $0x8] sm:$0xff pattern:$0x75316420] }
  0x40   :  { %422 = vst [vmem:[#allocation1] ss:$2 sm:$0xff] %v2857_v0  ;;  %198 = vrot.lane.b32.xlu2 %v193_v21, %s2730_s17 }
  0x45   :  { %v2889_v22 = vld.sshfl [vmem:[#allocation1 + $0x10] sm:$0xff pattern:$0x75316420]  ;;  %v2891_v23 = vld.sshfl [vmem:[#allocation1 + $0x18] sm:$0xff pattern:$0x75316420]  ;;  %196 = vrot.lane.b32.xlu0 %v192_v20, %s2730_s17 }
  0x46   :  { %835 = vst [vmem:[#allocation1 + $0x10] ss:$2 sm:$0xff] %v2857_v0  ;;  %s2738_s17 = smov 112   ;;  %v602_v20 = vperm.slane %v2975_v16, 3 }
  0x47   :  { %v423_v24 = vld.sshfl [vmem:[#allocation1 + $0x8] sm:$0xff pattern:$0x75316420] }
  0x48   :  { %424 = vrot.lane.b32.xlu1 %v423_v24, %s2735_s0  ;;  %427 = vst [vmem:[#allocation1] ss:$2 sm:$0xff] %v2864_v1  ;;  %585 = vrot.lane.b32.xlu2 %v578_v18, %s2731_s2  ;;  %v2410_v18 = vld [vmem:[%s3471_s3 + $0x8] sm:$0xf] }
  0x49   :  { %v457_v19 = vperm.slane %v2410_v18, 3  ;;  %v455_v54 = vperm.slane %v2410_v18, 1 }
  0x4d   :  { %v838_v25 = vld.sshfl [vmem:[#allocation1 + $0x10] sm:$0xff pattern:$0x75316420]  ;;  %v839_v26 = vld.sshfl [vmem:[#allocation1 + $0x18] sm:$0xff pattern:$0x75316420] }
  0x4e   :  { %980 = vst [vmem:[#allocation1 + $0x10] ss:$2 sm:$0xff] %v2857_v0  ;;  %846 = vrot.lane.b32.xlu0 %v839_v26, %s2736_s15 }
  0x4f   :  { %v431_v27 = vld.sshfl [vmem:[#allocation1 + $0x8] sm:$0xff pattern:$0x75316420]  ;;  %v430_v28 = vld.sshfl [vmem:[#allocation1] sm:$0xff pattern:$0x75316420] }
  0x50   :  { %436 = vrot.lane.b32.xlu1 %v431_v27, %s2735_s0  ;;  %567 = vst [vmem:[#allocation1] ss:$2 sm:$0xff] %v2857_v0  ;;  %434 = vrot.lane.b32.xlu2 %v430_v28, %s2735_s0 }
  0x55   :  { %v984_v32 = vld.sshfl [vmem:[#allocation1 + $0x18] sm:$0xff pattern:$0x75316420]  ;;  %v983_v33 = vld.sshfl [vmem:[#allocation1 + $0x10] sm:$0xff pattern:$0x75316420] }
  0x56   :  { %1125 = vst [vmem:[#allocation1 + $0x10] ss:$2 sm:$0xff] %v2857_v0 }
  0x57   :  { %v568_v34 = vld.sshfl [vmem:[#allocation1 + $0x8] sm:$0xff pattern:$0x75316420] }
  0x58   :  { %989 = vrot.lane.b32.xlu1 %v983_v33, %s2737_s16  ;;  %569 = vrot.lane.b32.xlu0 %v568_v34, %s2731_s2  ;;  %572 = vst [vmem:[#allocation1] ss:$2 sm:$0xff] %v2864_v1  ;;  %v216_v33 = vperm.slane %v2392_v4, 0 }
  0x59   :  { %844 = vrot.lane.b32.xlu2 %v838_v25, %s2736_s15 }
  0x5d   :  { %v1128_v37 = vld.sshfl [vmem:[#allocation1 + $0x10] sm:$0xff pattern:$0x75316420]  ;;  %v1129_v38 = vld.sshfl [vmem:[#allocation1 + $0x18] sm:$0xff pattern:$0x75316420] }
  0x5e   :  { %1270 = vst [vmem:[#allocation1 + $0x10] ss:$2 sm:$0xff] %v2857_v0 }
  0x5f   :  { %v576_v39 = vld.sshfl [vmem:[#allocation1 + $0x8] sm:$0xff pattern:$0x75316420]  ;;  %v575_v40 = vld.sshfl [vmem:[#allocation1] sm:$0xff pattern:$0x75316420] }
  0x60   :  { %581 = vrot.lane.b32.xlu0 %v576_v39, %s2731_s2  ;;  %579 = vrot.lane.b32.xlu1 %v575_v40, %s2731_s2  ;;  %731 = vst [vmem:[#allocation1] ss:$2 sm:$0xff] %v725_v36 }
  0x61   :  { %991 = vrot.lane.b32.xlu2 %v984_v32, %s2737_s16  ;;  %v217_v32 = vperm.slane %v2392_v4, 1  ;;  %v601_v4 = vperm.slane %v2975_v16, 2 }
  0x65   :  { %v1274_v53 = vld.sshfl [vmem:[#allocation1 + $0x18] sm:$0xff pattern:$0x75316420]  ;;  %v1273_v62 = vld.sshfl [vmem:[#allocation1 + $0x10] sm:$0xff pattern:$0x75316420] }
  0x67   :  { %v2916_v41 = vld.sshfl [vmem:[#allocation1] sm:$0xff pattern:$0x75316420]  ;;  %v2918_v42 = vld.sshfl [vmem:[#allocation1 + $0x8] sm:$0xff pattern:$0x75316420] }
  0x68   :  { %833 = vst [vmem:[#allocation1] ss:$2 sm:$0xff] %v2864_v1  ;;  %1134 = vrot.lane.b32.xlu0 %v1128_v37, %s2738_s17  ;;  %1136 = vrot.lane.b32.xlu1 %v1129_v38, %s2738_s17 }
  0x6f   :  { %v836_v43 = vld.sshfl [vmem:[#allocation1] sm:$0xff pattern:$0x75316420]  ;;  %v837_v44 = vld.sshfl [vmem:[#allocation1 + $0x8] sm:$0xff pattern:$0x75316420] }
  0x70   :  { %842 = vrot.lane.b32.xlu0 %v837_v44, %s2736_s15  ;;  %856 = vst [vmem:[#allocation1] ss:$2 sm:$0xff] %v2864_v1  ;;  %840 = vrot.lane.b32.xlu2 %v836_v43, %s2736_s15 }
  0x77   :  { %v857_v45 = vld.sshfl [vmem:[#allocation1] sm:$0xff pattern:$0x75316420] }
  0x78   :  { %858 = vrot.lane.b32.xlu1 %v857_v45, %s2736_s15  ;;  %978 = vst [vmem:[#allocation1] ss:$2 sm:$0xff] %v2864_v1 }
  0x7f   :  { %v982_v46 = vld.sshfl [vmem:[#allocation1 + $0x8] sm:$0xff pattern:$0x75316420]  ;;  %v981_v47 = vld.sshfl [vmem:[#allocation1] sm:$0xff pattern:$0x75316420]  ;;  %v2931_v48 = vpop.permute.xlu2 %141 }
  0x80   :  { %985 = vrot.lane.b32.xlu1 %v981_v47, %s2737_s16  ;;  %1001 = vst [vmem:[#allocation1] ss:$2 sm:$0xff] %v2864_v1  ;;  %987 = vrot.lane.b32.xlu2 %v982_v46, %s2737_s16 }
  0x87   :  { %v1002_v49 = vld.sshfl [vmem:[#allocation1] sm:$0xff pattern:$0x75316420]  ;;  %v2935_v50 = vpop.permute.xlu2 %154 }
  0x88   :  { %1003 = vrot.lane.b32.xlu0 %v1002_v49, %s2737_s16  ;;  %1123 = vst [vmem:[#allocation1] ss:$2 sm:$0xff] %v2864_v1 }
  0x8f   :  { %v1127_v51 = vld.sshfl [vmem:[#allocation1 + $0x8] sm:$0xff pattern:$0x75316420]  ;;  %v1126_v52 = vld.sshfl [vmem:[#allocation1] sm:$0xff pattern:$0x75316420] }
  0x90   :  { %1132 = vrot.lane.b32.xlu1 %v1127_v51, %s2738_s17  ;;  %1130 = vrot.lane.b32.xlu0 %v1126_v52, %s2738_s17  ;;  %1146 = vst [vmem:[#allocation1] ss:$2 sm:$0xff] %v2864_v1  ;;  %v2947_v59 = vpop.permute.xlu2 %438  ;;  %v456_v52 = vperm.slane %v2410_v18, 2 }
  0x96   :  { %v159_v55 = vpop.permute.xlu1 %158  ;;  %v157_v56 = vpop.permute.xlu0 %156 }
  0x97   :  { %v1147_v57 = vld.sshfl [vmem:[#allocation1] sm:$0xff pattern:$0x75316420]  ;;  %v162_v58 = vsel %vm160_vm1, %v2935_v50, %v157_v56  ;;  %v163_v7 = vsel %vm160_vm1, %v157_v56, %v159_v55 }
  0x98   :  { %1281 = vrot.lane.b32.xlu0 %v1274_v53, %s2739_s20  ;;  %1148 = vrot.lane.b32.xlu2 %v1147_v57, %s2738_s17  ;;  %1268 = vst [vmem:[#allocation1] ss:$2 sm:$0xff] %v2864_v1  ;;  %v181_v61 = vmul.f32 %v173_v60, %v162_v58  ;;  %v182_v10 = vmul.f32 %v174_v6, %v163_v7  ;;  %v454_v53 = vperm.slane %v2410_v18, 0  ;;  %v599_v7 = vperm.slane %v2975_v16, 0 }
  0x9a   :  { %2406 = vmatpush.msk.msra.mxu2 %vm234_vm0, %v181_v61  ;;  %v199_v5 = vpop.permute.xlu2 %198 }
  0x9b   :  { %2407 = vmatmul.msk.f32.vlgmr.msra.gmra.mxu2 %vm230_vm3, %v2962_v9 }
  0x9e   :  { %v201_v63 = vpop.permute.xlu1 %200 }
  0x9f   :  { %v1271_v0 = vld.sshfl [vmem:[#allocation1] sm:$0xff pattern:$0x75316420]  ;;  %v1272_v2 = vld.sshfl [vmem:[#allocation1 + $0x8] sm:$0xff pattern:$0x75316420]  ;;  %v153_v3 = vpop.permute.xlu0 %152  ;;  %v206_v31 = vsel %vm204_vm2, %v199_v5, %v201_v63 }
  0xa0   :  { %1277 = vrot.lane.b32.xlu0 %v1272_v2, %s2739_s20  ;;  %1291 = vst [vmem:[#allocation1] ss:$2 sm:$0xff] %v2864_v1  ;;  %1279 = vrot.lane.b32.xlu2 %v1273_v62, %s2739_s20  ;;  %v161_v36 = vsel %vm160_vm1, %v153_v3, %v2935_v50  ;;  %v168_v37 = vsel %vm160_vm1, %v2931_v48, %v153_v3  ;;  %v2411_v48 = vld [vmem:[%s3469_s1 + $0x10] sm:$0xff]  ;;  %v2431_v3 = vld [vmem:[%s3469_s1 + $0x20] sm:$0xff] }
  0xa1   :  { %v226_v39 = vmul.f32 %v218_v29, %v206_v31  ;;  %v180_v44 = vmul.f32 %v172_v30, %v161_v36  ;;  %v179_v47 = vmul.f32 %v171_v35, %v168_v37  ;;  %v3041_v2 = vld [vmem:[%s3471_s3 + $0x14] sm:$0xf]  ;;  %v2441_v37 = vld [vmem:[%s3469_s1 + $0x28] sm:$0xff] }
  0xa2   :  { %v586_v17 = vpop.permute.xlu2 %585  ;;  %v867_v6 = vperm.slane %v3041_v2, 2 }
  0xa6   :  { %v203_v1 = vpop.permute.xlu1 %202 }
  0xa7   :  { %v1292_v11 = vld.sshfl [vmem:[#allocation1] sm:$0xff pattern:$0x75316420]  ;;  %v207_v12 = vsel %vm204_vm2, %v201_v63, %v203_v1  ;;  %v187_v13 = vpop.permute.xlu0 %186 }
  0xa8   :  { %1293 = vrot.lane.b32.xlu1 %v1292_v11, %s2739_s20  ;;  %1275 = vrot.lane.b32.xlu2 %v1271_v0, %s2739_s20  ;;  %v227_v14 = vmul.f32 %v219_v8, %v207_v12 }
  0xaa   :  { %2400 = vmatpush.msk.msra.mxu3 %vm234_vm0, %v227_v14  ;;  %v435_v34 = vpop.permute.xlu2 %434 }
  0xab   :  { %2401 = vmatmul.msk.f32.vlgmr.msra.gmra.mxu3 %vm230_vm3, %v2393_v15 }
  0xac   :  { %2408 = vmatpush.msk.msrb.mxu3 %vm234_vm0, %v182_v10 }
  0xaf   :  { %v441_v21 = vpop.permute.xlu0 %440 }
  0xb0   :  { %v2982_v24 = vpop.permute.xlu1 %583  ;;  %v445_v25 = vsel %vm442_vm5, %v2947_v59, %v441_v21 }
  0xb1   :  { %v465_v26 = vmul.f32 %v457_v19, %v445_v25  ;;  %v590_v27 = vsel %vm587_vm4, %v2982_v24, %v586_v17 }
  0xb2   :  { %v610_v28 = vmul.f32 %v602_v20, %v590_v27  ;;  %v866_v27 = vperm.slane %v3041_v2, 1 }
  0xb3   :  { %2418 = vmatpush.msk.msra.mxu3 %vm234_vm0, %v465_v26  ;;  %v3012_v50 = vpop.permute.xlu2 %844 }
  0xb4   :  { %2409 = vmatmul.msk.f32.vlgmr.msrb.gmra.mxu3 %vm230_vm3, %v2962_v9 }
  0xb5   :  { %2428 = vmatpush.msk.msrb.mxu3 %vm234_vm0, %v610_v28 }
  0xb7   :  { %v197_v38 = vpop.permute.xlu0 %196 }
  0xb8   :  { %v205_v40 = vsel %vm204_vm2, %v197_v38, %v199_v5  ;;  %v212_v43 = vsel %vm204_vm2, %v187_v13, %v197_v38  ;;  %v600_v5 = vperm.slane %v2975_v16, 1  ;;  %v3061_v16 = vld [vmem:[%s3471_s3 + $0x18] sm:$0xf] }
  0xb9   :  { %v225_v45 = vmul.f32 %v217_v32, %v205_v40  ;;  %v224_v46 = vmul.f32 %v216_v33, %v212_v43  ;;  %v1012_v19 = vperm.slane %v3061_v16, 2  ;;  %v1011_v28 = vperm.slane %v3061_v16, 1 }
  0xba   :  { %v425_v49 = vpop.permute.xlu1 %424 }
  0xbb   :  { %2396 = vmatpush.msk.msra.mxu1 %vm234_vm0, %v225_v45  ;;  %2394 = vmatpush.msk.msra.mxu0 %vm234_vm0, %v224_v46  ;;  %v450_v55 = vsel %vm442_vm5, %v425_v49, %v435_v34  ;;  %v2451_v45 = vld [vmem:[%s3469_s1 + $0x30] sm:$0xff]  ;;  %v1010_v46 = vperm.slane %v3061_v16, 0 }
  0xbc   :  { %2397 = vmatmul.msk.f32.vlgmr.msra.gmra.mxu1 %vm230_vm3, %v2393_v15  ;;  %2395 = vmatmul.msk.f32.vlgmr.msra.gmra.mxu0 %vm230_vm3, %v2393_v15  ;;  %v462_v61 = vmul.f32 %v454_v53, %v450_v55 }
  0xbd   :  { %2398 = vmatpush.msk.msrb.mxu0 %vm234_vm0, %v226_v39  ;;  %2404 = vmatpush.msk.msrb.mxu1 %vm234_vm0, %v180_v44  ;;  %v868_v39 = vperm.slane %v3041_v2, 3 }
  0xbe   :  { %2419 = vmatmul.msk.f32.vlgmr.msra.gmra.mxu3 %vm230_vm3, %v2411_v48 }
  0xbf   :  { %2402 = vmatpush.msk.msra.mxu0 %vm234_vm0, %v179_v47  ;;  %2438 = vmatpush.msk.msra.mxu3 %vm234_vm0, %v2891_v23  ;;  %v2421_v23 = vld [vmem:[%s3469_s1 + $0x18] sm:$0xff] }
  0xc0   :  { %v3016_v51 = vpop.permute.xlu0 %846 }
  0xc1   :  { %v851_v8 = vsel %vm848_vm6, %v3012_v50, %v3016_v51 }
  0xc2   :  { %v437_v56 = vpop.permute.xlu1 %436  ;;  %v875_v17 = vmul.f32 %v867_v6, %v851_v8 }
  0xc3   :  { %v444_v57 = vsel %vm442_vm5, %v437_v56, %v2947_v59  ;;  %v443_v58 = vsel %vm442_vm5, %v435_v34, %v437_v56  ;;  %v3033_v59 = vpop.permute.xlu2 %991 }
  0xc4   :  { %v464_v60 = vmul.f32 %v456_v52, %v444_v57  ;;  %2405 = vmatmul.msk.f32.vlgmr.msrb.gmra.mxu1 %vm230_vm3, %v2962_v9  ;;  %v463_v62 = vmul.f32 %v455_v54, %v443_v58  ;;  %2399 = vmatmul.msk.f32.vlgmr.msrb.gmra.mxu0 %vm230_vm3, %v2393_v15  ;;  %v1013_v52 = vperm.slane %v3061_v16, 3 }
  0xc5   :  { %2412 = vmatpush.msk.msrb.mxu0 %vm234_vm0, %v462_v61 }
  0xc6   :  { %2414 = vmatpush.msk.msra.mxu1 %vm234_vm0, %v463_v62  ;;  %2416 = vmatpush.msk.msrb.mxu2 %vm234_vm0, %v464_v60  ;;  %v1413_v60 = vld [vmem:[#allocation2] sm:$0xff] }
  0xc7   :  { %2417 = vmatmul.msk.f32.vlgmr.msrb.gmra.mxu2 %vm230_vm3, %v2411_v48  ;;  %2429 = vmatmul.msk.f32.vlgmr.msrb.gmra.mxu3 %vm230_vm3, %v2421_v23 }
  0xca   :  { %v990_v63 = vpop.permute.xlu1 %989  ;;  %v570_v0 = vpop.permute.xlu0 %569 }
  0xcb   :  { %v841_v15 = vpop.permute.xlu2 %840  ;;  %v996_v20 = vsel %vm993_vm7, %v990_v63, %v3033_v59 }
  0xcc   :  { %2415 = vmatmul.msk.f32.vlgmr.msra.gmra.mxu1 %vm230_vm3, %v2411_v48  ;;  %2403 = vmatmul.msk.f32.vlgmr.msra.gmra.mxu0 %vm230_vm3, %v2962_v9 }
  0xcf   :  { %2439 = vmatmul.msk.f32.vlgmr.msra.gmra.mxu3 %vm230_vm3, %v2431_v3 }
  0xd2   :  { %v582_v9 = vpop.permute.xlu0 %581  ;;  %v580_v1 = vpop.permute.xlu1 %579 }
  0xd3   :  { %v589_v10 = vsel %vm587_vm4, %v582_v9, %v2982_v24  ;;  %v588_v11 = vsel %vm587_vm4, %v580_v1, %v582_v9  ;;  %v595_v12 = vsel %vm587_vm4, %v570_v0, %v580_v1  ;;  %v1020_v24 = vmul.f32 %v1012_v19, %v996_v20 }
  0xd4   :  { %v609_v13 = vmul.f32 %v601_v4, %v589_v10  ;;  %v608_v14 = vmul.f32 %v600_v5, %v588_v11  ;;  %v607_v18 = vmul.f32 %v599_v7, %v595_v12  ;;  %2413 = vmatmul.msk.f32.vlgmr.msrb.gmra.mxu0 %vm230_vm3, %v2411_v48  ;;  %v2470_v5 = vld [vmem:[%s3471_s3 + $0x20] sm:$0xf] }
  0xd5   :  { %v1302_v7 = vperm.slane %v2470_v5, 2  ;;  %v2471_v10 = vld [vmem:[%s3469_s1 + $0x40] sm:$0xff]  ;;  %v1301_v11 = vperm.slane %v2470_v5, 1  ;;  %v1300_v12 = vperm.slane %v2470_v5, 0  ;;  %v1303_v19 = vperm.slane %v2470_v5, 3 }
  0xd6   :  { %2424 = vmatpush.msk.msrb.mxu1 %vm234_vm0, %v608_v14  ;;  %2426 = vmatpush.msk.msra.mxu2 %vm234_vm0, %v609_v13 }
  0xd7   :  { %2425 = vmatmul.msk.f32.vlgmr.msrb.gmra.mxu1 %vm230_vm3, %v2421_v23  ;;  %2427 = vmatmul.msk.f32.vlgmr.msra.gmra.mxu2 %vm230_vm3, %v2421_v23 }
  0xd8   :  { %2434 = vmatpush.msk.msra.mxu1 %vm234_vm0, %v2918_v42  ;;  %2436 = vmatpush.msk.msrb.mxu2 %vm234_vm0, %v2889_v22  ;;  %v3084_v42 = vld [vmem:[%s3471_s3 + $0x1c] sm:$0xf] }
  0xd9   :  { %2422 = vmatpush.msk.msra.mxu0 %vm234_vm0, %v607_v18  ;;  %v1157_v25 = vperm.slane %v3084_v42, 2  ;;  %v1158_v53 = vperm.slane %v3084_v42, 3  ;;  %v1156_v61 = vperm.slane %v3084_v42, 1  ;;  %v1155_v62 = vperm.slane %v3084_v42, 0 }
  0xda   :  { %2446 = vmatpush.msk.msra.mxu2 %vm234_vm0, %v875_v17  ;;  %v3077_v21 = vpop.permute.xlu0 %1134  ;;  %v988_v22 = vpop.permute.xlu2 %987 }
  0xdb   :  { %2432 = vmatpush.msk.msrb.mxu0 %vm234_vm0, %v2916_v41  ;;  %v1137_v26 = vpop.permute.xlu1 %1136  ;;  %v865_v41 = vperm.slane %v3041_v2, 0  ;;  %v995_v30 = vsel %vm993_vm7, %v988_v22, %v990_v63 }
  0xdc   :  { %2423 = vmatmul.msk.f32.vlgmr.msra.gmra.mxu0 %vm230_vm3, %v2421_v23  ;;  %v1141_v29 = vsel %vm1138_vm8, %v3077_v21, %v1137_v26  ;;  %v1019_v38 = vmul.f32 %v1011_v28, %v995_v30  ;;  %v2740_v23 = vmov 0  }
  0xdd   :  { %v1165_v34 = vmul.f32 %v1157_v25, %v1141_v29  ;;  %2540 = vset.pattern.permute.xlu1 %v2740_v23  ;;  %2562 = vset.pattern.permute.xlu0 %v2740_v23 }
  0xde   :  { %1416 = vperm.xlu1 %2540, %v1413_v60   ;;  %2561 = vset.pattern.permute.xlu2 %v2740_v23 }
  0xdf   :  { %2435 = vmatmul.msk.f32.vlgmr.msra.gmra.mxu1 %vm230_vm3, %v2431_v3  ;;  %2437 = vmatmul.msk.f32.vlgmr.msrb.gmra.mxu2 %vm230_vm3, %v2431_v3 }
  0xe0   :  { %2456 = vmatpush.msk.msrb.mxu2 %vm234_vm0, %v1020_v24 }
  0xe2   :  { %v843_v31 = vpop.permute.xlu0 %842 }
  0xe3   :  { %v850_v32 = vsel %vm848_vm6, %v843_v31, %v3012_v50  ;;  %v849_v33 = vsel %vm848_vm6, %v841_v15, %v843_v31  ;;  %v2461_v50 = vld [vmem:[%s3469_s1 + $0x38] sm:$0xff] }
  0xe4   :  { %v874_v35 = vmul.f32 %v866_v27, %v850_v32  ;;  %v873_v36 = vmul.f32 %v865_v41, %v849_v33  ;;  %2433 = vmatmul.msk.f32.vlgmr.msrb.gmra.mxu0 %vm230_vm3, %v2431_v3 }
  0xe6   :  { %2444 = vmatpush.msk.msrb.mxu1 %vm234_vm0, %v874_v35  ;;  %2442 = vmatpush.msk.msra.mxu0 %vm234_vm0, %v873_v36 }
  0xe7   :  { %2445 = vmatmul.msk.f32.vlgmr.msrb.gmra.mxu1 %vm230_vm3, %v2441_v37  ;;  %2447 = vmatmul.msk.f32.vlgmr.msra.gmra.mxu2 %vm230_vm3, %v2441_v37 }
  0xe8   :  { %2454 = vmatpush.msk.msra.mxu1 %vm234_vm0, %v1019_v38  ;;  %2466 = vmatpush.msk.msra.mxu2 %vm234_vm0, %v1165_v34 }
  0xea   :  { %v859_v40 = vpop.permute.xlu1 %858 }
  0xeb   :  { %v861_v43 = vsel %vm848_vm6, %v3016_v51, %v859_v40 }
  0xec   :  { %v876_v44 = vmul.f32 %v868_v39, %v861_v43  ;;  %2443 = vmatmul.msk.f32.vlgmr.msra.gmra.mxu0 %vm230_vm3, %v2441_v37 }
  0xee   :  { %2448 = vmatpush.msk.msrb.mxu3 %vm234_vm0, %v876_v44 }
  0xef   :  { %2449 = vmatmul.msk.f32.vlgmr.msrb.gmra.mxu3 %vm230_vm3, %v2441_v37  ;;  %2455 = vmatmul.msk.f32.vlgmr.msra.gmra.mxu1 %vm230_vm3, %v2451_v45 }
  0xf0   :  { %2457 = vmatmul.msk.f32.vlgmr.msrb.gmra.mxu2 %vm230_vm3, %v2451_v45 }
  0xf2   :  { %v986_v47 = vpop.permute.xlu1 %985  ;;  %v1149_v51 = vpop.permute.xlu2 %1148 }
  0xf3   :  { %v994_v49 = vsel %vm993_vm7, %v986_v47, %v988_v22  ;;  %v1151_v54 = vsel %vm1138_vm8, %v1137_v26, %v1149_v51 }
  0xf4   :  { %v1018_v48 = vmul.f32 %v1010_v46, %v994_v49  ;;  %v1166_v58 = vmul.f32 %v1158_v53, %v1151_v54 }
  0xf6   :  { %2452 = vmatpush.msk.msrb.mxu0 %vm234_vm0, %v1018_v48 }
  0xf7   :  { %2453 = vmatmul.msk.f32.vlgmr.msrb.gmra.mxu0 %vm230_vm3, %v2451_v45 }
  0xf8   :  { %2467 = vmatmul.msk.f32.vlgmr.msra.gmra.mxu2 %vm230_vm3, %v2461_v50 }
  0xfa   :  { %v1004_v55 = vpop.permute.xlu0 %1003  ;;  %v1280_v6 = vpop.permute.xlu2 %1279 }
  0xfb   :  { %v1006_v56 = vsel %vm993_vm7, %v3033_v59, %v1004_v55 }
  0xfc   :  { %v1021_v57 = vmul.f32 %v1013_v52, %v1006_v56 }
  0xfe   :  { %2458 = vmatpush.msk.msra.mxu3 %vm234_vm0, %v1021_v57 }
  0xff   :  { %2459 = vmatmul.msk.f32.vlgmr.msra.gmra.mxu3 %vm230_vm3, %v2451_v45 }
 0x100   :  { %2468 = vmatpush.msk.msrb.mxu3 %vm234_vm0, %v1166_v58 }
 0x102   :  { %v1133_v63 = vpop.permute.xlu1 %1132  ;;  %v1131_v0 = vpop.permute.xlu0 %1130 }
 0x103   :  { %v1140_v59 = vsel %vm1138_vm8, %v1133_v63, %v3077_v21  ;;  %v1139_v2 = vsel %vm1138_vm8, %v1131_v0, %v1133_v63  ;;  %v1276_v13 = vpop.permute.xlu2 %1275 }
 0x104   :  { %v1164_v3 = vmul.f32 %v1156_v61, %v1140_v59  ;;  %v1163_v4 = vmul.f32 %v1155_v62, %v1139_v2 }
 0x106   :  { %2462 = vmatpush.msk.msra.mxu0 %vm234_vm0, %v1163_v4  ;;  %2464 = vmatpush.msk.msrb.mxu1 %vm234_vm0, %v1164_v3 }
 0x107   :  { %2463 = vmatmul.msk.f32.vlgmr.msra.gmra.mxu0 %vm230_vm3, %v2461_v50  ;;  %2465 = vmatmul.msk.f32.vlgmr.msrb.gmra.mxu1 %vm230_vm3, %v2461_v50 }
 0x108   :  { %2469 = vmatmul.msk.f32.vlgmr.msrb.gmra.mxu3 %vm230_vm3, %v2461_v50 }
 0x10a   :  { %v1282_v8 = vpop.permute.xlu0 %1281 }
 0x10b   :  { %v1286_v9 = vsel %vm1283_vm9, %v1280_v6, %v1282_v8 }
 0x10c   :  { %v1310_v1 = vmul.f32 %v1302_v7, %v1286_v9 }
 0x10e   :  { %2476 = vmatpush.msk.msrb.mxu2 %vm234_vm0, %v1310_v1 }
 0x10f   :  { %2477 = vmatmul.msk.f32.vlgmr.msrb.gmra.mxu2 %vm230_vm3, %v2471_v10 }
 0x112   :  { %v1278_v14 = vpop.permute.xlu0 %1277 }
 0x113   :  { %v1285_v15 = vsel %vm1283_vm9, %v1278_v14, %v1280_v6  ;;  %v1284_v17 = vsel %vm1283_vm9, %v1276_v13, %v1278_v14 }
 0x114   :  { %v1309_v18 = vmul.f32 %v1301_v11, %v1285_v15  ;;  %v1308_v16 = vmul.f32 %v1300_v12, %v1284_v17 }
 0x116   :  { %2472 = vmatpush.msk.msrb.mxu0 %vm234_vm0, %v1308_v16  ;;  %2474 = vmatpush.msk.msra.mxu1 %vm234_vm0, %v1309_v18 }
 0x117   :  { %2473 = vmatmul.msk.f32.vlgmr.msrb.gmra.mxu0 %vm230_vm3, %v2471_v10  ;;  %2475 = vmatmul.msk.f32.vlgmr.msra.gmra.mxu1 %vm230_vm3, %v2471_v10 }
 0x11a   :  { %v1294_v20 = vpop.permute.xlu1 %1293 }
 0x11b   :  { %v1296_v21 = vsel %vm1283_vm9, %v1282_v8, %v1294_v20 }
 0x11c   :  { %v1311_v24 = vmul.f32 %v1303_v19, %v1296_v21 }
 0x11e   :  { %2478 = vmatpush.msk.msra.mxu3 %vm234_vm0, %v1311_v24  ;;  %v399_v26 = vpop.f32.mrf.mxu2 }
 0x11f   :  { %2479 = vmatmul.msk.f32.vlgmr.msra.gmra.mxu3 %vm230_vm3, %v2471_v10 }
 0x12e   :  { %v324_v28 = vpop.f32.mrf.mxu3 }
 0x137   :  { %v419_v32 = vpop.f32.mrf.mxu3 }
 0x138   :  { %v420_v6 = vadd.f32 %v419_v32, %v324_v28 }
 0x139   :  { %v264_v42 = vpop.f32.mrf.mxu0  ;;  %v284_v25 = vpop.f32.mrf.mxu1 }
 0x141   :  { %v304_v22 = vpop.f32.mrf.mxu0  ;;  %v379_v41 = vpop.f32.mrf.mxu1 }
 0x142   :  { %v560_v36 = vpop.f32.mrf.mxu3  ;;  %v400_v45 = vadd.f32 %v399_v26, %v304_v22  ;;  %v380_v47 = vadd.f32 %v379_v41, %v284_v25 }
 0x143   :  { %v566_v12 = vadd.f32 %v560_v36, %v420_v6 }
 0x149   :  { %v359_v27 = vpop.f32.mrf.mxu0  ;;  %v520_v31 = vpop.f32.mrf.mxu1 }
 0x14a   :  { %v540_v29 = vpop.f32.mrf.mxu2  ;;  %v705_v40 = vpop.f32.mrf.mxu3  ;;  %v360_v49 = vadd.f32 %v359_v27, %v264_v42  ;;  %v564_v52 = vadd.f32 %v520_v31, %v380_v47  ;;  %v1491_v47 = vld [vmem:[#allocation4 + $0x50] sm:$0xff] }
 0x14b   :  { %v565_v48 = vadd.f32 %v540_v29, %v400_v45  ;;  %v711_v21 = vadd.f32 %v705_v40, %v566_v12  ;;  %v1493_v40 = vld [vmem:[#allocation4 + $0x60] sm:$0xff]  ;;  %v1544_v45 = vld [vmem:[#allocation4 + $0x1f8] sm:$0xff]  ;;  %v1526_v12 = vld [vmem:[#allocation4 + $0x168] sm:$0xff] }
 0x14c   :  { %1605 = vmatpush.msrb.mxu3 %v1544_v45  ;;  %v1532_v45 = vld [vmem:[#allocation4 + $0x198] sm:$0xff] }
 0x150   :  { %v1417_v11 = vpop.permute.xlu1 %1416 }
 0x151   :  { %v500_v30 = vpop.f32.mrf.mxu0 }
 0x152   :  { %v826_v50 = vpop.f32.mrf.mxu3  ;;  %v563_v53 = vadd.f32 %v500_v30, %v360_v49  ;;  %v1490_v49 = vld [vmem:[#allocation4 + $0x48] sm:$0xff] }
 0x153   :  { %v832_v41 = vadd.f32 %v826_v50, %v711_v21  ;;  %v1488_v50 = vld [vmem:[#allocation4 + $0x38] sm:$0xff]  ;;  %v1507_v21 = vld [vmem:[#allocation4 + $0xd0] sm:$0xff] }
 0x154   :  { %v665_v35 = vpop.f32.mrf.mxu1 }
 0x155   :  { %v709_v57 = vadd.f32 %v665_v35, %v564_v52  ;;  %v1486_v52 = vld [vmem:[#allocation4 + $0x28] sm:$0xff] }
 0x159   :  { %v645_v34 = vpop.f32.mrf.mxu0 }
 0x15a   :  { %v685_v33 = vpop.f32.mrf.mxu2  ;;  %v708_v58 = vadd.f32 %v645_v34, %v563_v53  ;;  %v1485_v53 = vld [vmem:[#allocation4 + $0x20] sm:$0xff] }
 0x15b   :  { %v710_v54 = vadd.f32 %v685_v33, %v565_v48  ;;  %v1489_v48 = vld [vmem:[#allocation4 + $0x40] sm:$0xff] }
 0x15c   :  { %v786_v39 = vpop.f32.mrf.mxu1 }
 0x15d   :  { %v830_v62 = vadd.f32 %v786_v39, %v709_v57  ;;  %v1494_v39 = vld [vmem:[#allocation4 + $0x68] sm:$0xff] }
 0x161   :  { %v766_v38 = vpop.f32.mrf.mxu0 }
 0x162   :  { %v806_v37 = vpop.f32.mrf.mxu2  ;;  %v829_v23 = vadd.f32 %v766_v38, %v708_v58  ;;  %v1495_v38 = vld [vmem:[#allocation4 + $0x70] sm:$0xff] }
 0x163   :  { %v831_v60 = vadd.f32 %v806_v37, %v710_v54  ;;  %v1496_v37 = vld [vmem:[#allocation4 + $0x78] sm:$0xff] }
 0x164   :  { %v931_v46 = vpop.f32.mrf.mxu1  ;;  %1545 = vmatpush.msra.mxu0 %v1496_v37  ;;  %v1534_v37 = vld [vmem:[#allocation4 + $0x1a8] sm:$0xff] }
 0x165   :  { %v975_v3 = vadd.f32 %v931_v46, %v830_v62  ;;  %v1492_v46 = vld [vmem:[#allocation4 + $0x58] sm:$0xff] }
 0x166   :  { %1546 = vmatpush.msra.mxu0 %v1495_v38  ;;  %v1501_v38 = vld [vmem:[#allocation4 + $0xa0] sm:$0xff] }
 0x168   :  { %1547 = vmatpush.msra.mxu0 %v1494_v39  ;;  %v1517_v39 = vld [vmem:[#allocation4 + $0x120] sm:$0xff] }
 0x169   :  { %v911_v44 = vpop.f32.mrf.mxu0 }
 0x16a   :  { %v951_v43 = vpop.f32.mrf.mxu2  ;;  %v974_v4 = vadd.f32 %v911_v44, %v829_v23  ;;  %v1528_v44 = vld [vmem:[#allocation4 + $0x178] sm:$0xff]  ;;  %1548 = vmatpush.msra.mxu0 %v1493_v40  ;;  %v1533_v40 = vld [vmem:[#allocation4 + $0x1a0] sm:$0xff] }
 0x16b   :  { %v976_v63 = vadd.f32 %v951_v43, %v831_v60  ;;  %v1512_v43 = vld [vmem:[#allocation4 + $0xf8] sm:$0xff]  ;;  %1585 = vmatpush.msra.mxu2 %v1528_v44 }
 0x16c   :  { %v1076_v56 = vpop.f32.mrf.mxu1  ;;  %1565 = vmatpush.msrb.mxu1 %v1512_v43  ;;  %1549 = vmatpush.msra.mxu0 %v1492_v46  ;;  %v1500_v43 = vld [vmem:[#allocation4 + $0x98] sm:$0xff]  ;;  %v1499_v46 = vld [vmem:[#allocation4 + $0x90] sm:$0xff] }
 0x16d   :  { %v1120_v8 = vadd.f32 %v1076_v56, %v975_v3  ;;  %v1516_v44 = vld [vmem:[#allocation4 + $0x118] sm:$0xff] }
 0x16e   :  { %1550 = vmatpush.msra.mxu0 %v1491_v47  ;;  %v1515_v47 = vld [vmem:[#allocation4 + $0x110] sm:$0xff] }
 0x170   :  { %1551 = vmatpush.msra.mxu0 %v1490_v49  ;;  %v1531_v49 = vld [vmem:[#allocation4 + $0x190] sm:$0xff] }
 0x172   :  { %v971_v61 = vpop.f32.mrf.mxu3  ;;  %1552 = vmatpush.msra.mxu0 %v1489_v48  ;;  %v1498_v48 = vld [vmem:[#allocation4 + $0x88] sm:$0xff] }
 0x173   :  { %v1096_v51 = vpop.f32.mrf.mxu2  ;;  %v977_v29 = vadd.f32 %v971_v61, %v832_v41  ;;  %v1521_v41 = vld [vmem:[#allocation4 + $0x140] sm:$0xff] }
 0x174   :  { %v1056_v55 = vpop.f32.mrf.mxu0  ;;  %v1121_v5 = vadd.f32 %v1096_v51, %v976_v63  ;;  %v1487_v51 = vld [vmem:[#allocation4 + $0x30] sm:$0xff]  ;;  %1553 = vmatpush.msra.mxu0 %v1488_v50  ;;  %v1514_v50 = vld [vmem:[#allocation4 + $0x108] sm:$0xff] }
 0x175   :  { %v1119_v9 = vadd.f32 %v1056_v55, %v974_v4  ;;  %v1484_v55 = vld [vmem:[#allocation4 + $0x18] sm:$0xff] }
 0x176   :  { %1554 = vmatpush.msra.mxu0 %v1487_v51  ;;  %v1530_v51 = vld [vmem:[#allocation4 + $0x188] sm:$0xff] }
 0x178   :  { %1555 = vmatpush.msra.mxu0 %v1486_v52  ;;  %v1497_v52 = vld [vmem:[#allocation4 + $0x80] sm:$0xff] }
 0x17a   :  { %1556 = vmatpush.msra.mxu0 %v1485_v53  ;;  %v1513_v53 = vld [vmem:[#allocation4 + $0x100] sm:$0xff] }
 0x17b   :  { %v1241_v0 = vpop.f32.mrf.mxu2 }
 0x17c   :  { %v1266_v1 = vadd.f32 %v1241_v0, %v1121_v5  ;;  %1557 = vmatpush.msra.mxu0 %v1484_v55 }
 0x182   :  { %v1116_v7 = vpop.f32.mrf.mxu3 }
 0x183   :  { %v1122_v30 = vadd.f32 %v1116_v7, %v977_v29  ;;  %v1483_v7 = vld [vmem:[#allocation4 + $0x10] sm:$0xff]  ;;  %v1504_v29 = vld [vmem:[#allocation4 + $0xb8] sm:$0xff] }
 0x184   :  { %v1201_v59 = vpop.f32.mrf.mxu0  ;;  %v1221_v2 = vpop.f32.mrf.mxu1  ;;  %1558 = vmatpush.msra.mxu0 %v1483_v7 }
 0x185   :  { %v1264_v13 = vadd.f32 %v1201_v59, %v1119_v9  ;;  %v1265_v14 = vadd.f32 %v1221_v2, %v1120_v8  ;;  %v1511_v8 = vld [vmem:[#allocation4 + $0xf0] sm:$0xff] }
 0x186   :  { %v1527_v9 = vld [vmem:[#allocation4 + $0x170] sm:$0xff]  ;;  %1566 = vmatpush.msrb.mxu1 %v1511_v8 }
 0x187   :  { %1586 = vmatpush.msra.mxu2 %v1527_v9 }
 0x189   :  { %1587 = vmatpush.msra.mxu2 %v1526_v12 }
 0x18b   :  { %v1261_v27 = vpop.f32.mrf.mxu3 }
 0x18c   :  { %v1267_v31 = vadd.f32 %v1261_v27, %v1122_v30  ;;  %v1505_v27 = vld [vmem:[#allocation4 + $0xc0] sm:$0xff]  ;;  %v1520_v30 = vld [vmem:[#allocation4 + $0x138] sm:$0xff] }
 0x192   :  { %v1386_v10 = vpop.f32.mrf.mxu2 }
 0x193   :  { %v1411_v15 = vadd.f32 %v1386_v10, %v1266_v1  ;;  %v1543_v1 = vld [vmem:[#allocation4 + $0x1f0] sm:$0xff]  ;;  %v1482_v10 = vld [vmem:[#allocation4 + $0x8] sm:$0xff] }
 0x194   :  { %v1366_v17 = vpop.f32.mrf.mxu1  ;;  %v1346_v18 = vpop.f32.mrf.mxu0  ;;  %1606 = vmatpush.msrb.mxu3 %v1543_v1  ;;  %1559 = vmatpush.msra.mxu0 %v1482_v10 }
 0x195   :  { %v1410_v16 = vadd.f32 %v1366_v17, %v1265_v14  ;;  %v1421_v19 = vadd.f32 %v1417_v11, %v1411_v15  ;;  %v1409_v20 = vadd.f32 %v1346_v18, %v1264_v13  ;;  %v1542_v13 = vld [vmem:[#allocation4 + $0x1e8] sm:$0xff]  ;;  %v1481_v14 = vld [vmem:[#allocation4] sm:$0xff] }
 0x196   :  { %v1509_v15 = vld [vmem:[#allocation4 + $0xe0] sm:$0xff]  ;;  %1607 = vmatpush.msrb.mxu3 %v1542_v13  ;;  %1560 = vmatpush.msra.mxu0 %v1481_v14  ;;  %v2486_v14 = vld [vmem:[%s3473_s5 + $0x20] sm:$0xff] }
 0x197   :  { %v1420_v24 = vadd.f32 %v1417_v11, %v1410_v16  ;;  %v3165_v42 = vmax.f32 %v1421_v19, 0.0  ;;  %v1419_v22 = vadd.f32 %v1417_v11, %v1409_v20  ;;  %v1525_v17 = vld [vmem:[#allocation4 + $0x160] sm:$0xff]  ;;  %v1508_v16 = vld [vmem:[#allocation4 + $0xd8] sm:$0xff] }
 0x198   :  { %v1541_v18 = vld [vmem:[#allocation4 + $0x1e0] sm:$0xff]  ;;  %v1524_v19 = vld [vmem:[#allocation4 + $0x158] sm:$0xff]  ;;  %1588 = vmatpush.msra.mxu2 %v1525_v17 }
 0x199   :  { %v3167_v25 = vmax.f32 %v1420_v24, 0.0  ;;  %1429 = vst [vmem:[%s3480_s12 + $0x10] sm:$0xff] %v3165_v42  ;;  %v1423_v26 = vmax.f32 %v1419_v22, 0.0  ;;  %v1540_v20 = vld [vmem:[#allocation4 + $0x1d8] sm:$0xff]  ;;  %1608 = vmatpush.msrb.mxu3 %v1541_v18  ;;  %v1523_v24 = vld [vmem:[#allocation4 + $0x150] sm:$0xff]  ;;  %v1506_v22 = vld [vmem:[#allocation4 + $0xc8] sm:$0xff] }
 0x19a   :  { %1589 = vmatpush.msra.mxu2 %v1524_v19  ;;  %v2565_v17 = vld [vmem:[#allocation6 + $0x1] ss:$0 sm:$0xff]  ;;  %v2566_v18 = vld [vmem:[#allocation6] ss:$0 sm:$0xff] }
 0x19b   :  { %1428 = vst [vmem:[%s3480_s12 + $0x8] sm:$0xff] %v3167_v25  ;;  %v2541_v28 = vpack.i.bf16 %v3165_v42, %v1423_v26  ;;  %1609 = vmatpush.msrb.mxu3 %v1540_v20 }
 0x19c   :  { %1427 = vst [vmem:[%s3480_s12] sm:$0xff] %v1423_v26  ;;  %1590 = vmatpush.msra.mxu2 %v1523_v24 }
 0x19d   :  { %2542 = vrot.lane.b32.xlu2 %v2541_v28, %s2736_s15  ;;  %v1537_v28 = vld [vmem:[#allocation4 + $0x1c0] sm:$0xff] }
 0x1a2   :  { %v1406_v32 = vpop.f32.mrf.mxu3 }
 0x1a3   :  { %v1412_v33 = vadd.f32 %v1406_v32, %v1267_v31  ;;  %v1536_v31 = vld [vmem:[#allocation4 + $0x1b8] sm:$0xff]  ;;  %v1503_v32 = vld [vmem:[#allocation4 + $0xb0] sm:$0xff] }
 0x1a5   :  { %v1422_v34 = vadd.f32 %v1417_v11, %v1412_v33  ;;  %v1510_v11 = vld [vmem:[#allocation4 + $0xe8] sm:$0xff]  ;;  %v1519_v33 = vld [vmem:[#allocation4 + $0x130] sm:$0xff] }
 0x1a6   :  { %1567 = vmatpush.msrb.mxu1 %v1510_v11 }
 0x1a7   :  { %v1426_v35 = vmax.f32 %v1422_v34, 0.0  ;;  %v1535_v34 = vld [vmem:[#allocation4 + $0x1b0] sm:$0xff] }
 0x1a8   :  { %1568 = vmatpush.msrb.mxu1 %v1509_v15  ;;  %v2487_v15 = vld [vmem:[%s3473_s5 + $0x28] sm:$0xff] }
 0x1a9   :  { %1430 = vst [vmem:[%s3480_s12 + $0x18] sm:$0xff] %v1426_v35  ;;  %v2546_v36 = vpack.i.bf16 %v3167_v25, %v1426_v35  ;;  %s2741_s12 = smov 7  }
 0x1aa   :  { %1569 = vmatpush.msrb.mxu1 %v1508_v16  ;;  %v2567_v16 = vld [vmem:[#allocation6 + $0x4] ss:$0 sm:$0xff] }
 0x1ab   :  { %2547 = vrot.lane.b32.xlu0 %v2546_v36, %s2736_s15  ;;  %v1518_v36 = vld [vmem:[#allocation4 + $0x128] sm:$0xff] }
 0x1ac   :  { %1570 = vmatpush.msrb.mxu1 %v1507_v21 }
 0x1ae   :  { %1571 = vmatpush.msrb.mxu1 %v1506_v22 }
 0x1b0   :  { %1572 = vmatpush.msrb.mxu1 %v1505_v27  ;;  %v2569_v27 = vld [vmem:[#allocation6 + $0x3] ss:$0 sm:$0xff] }
 0x1b2   :  { %1573 = vmatpush.msrb.mxu1 %v1504_v29 }
 0x1b4   :  { %1574 = vmatpush.msrb.mxu1 %v1503_v32  ;;  %v2502_v32 = vld [vmem:[%s3473_s5 + $0x60] sm:$0xff] }
 0x1f7   :  { %v2543_v54 = vpop.permute.xlu2 %2542 }
 0x1f8   :  { %v2545_v57 = vunpack.i.h.bf16 %v2543_v54  ;;  %v2544_v58 = vunpack.i.l.bf16 %v2543_v54  ;;  %v1529_v54 = vld [vmem:[#allocation4 + $0x180] sm:$0xff] }
 0x21d   :  { %v2548_v56 = vpop.permute.xlu0 %2547 }
 0x21e   :  { %v2550_v60 = vunpack.i.h.bf16 %v2548_v56  ;;  %v2549_v61 = vunpack.i.l.bf16 %v2548_v56 }
 0x220   :  { %v1443_v62 = vsel %vm848_vm6, %v2544_v58, %v2550_v60  ;;  %v1444_v23 = vsel %vm848_vm6, %v2550_v60, %v2545_v57  ;;  %v1445_v63 = vsel %vm848_vm6, %v2545_v57, %v2549_v61  ;;  %v1451_v0 = vsel %vm848_vm6, %v2549_v61, %v2544_v58 }
 0x221   :  { %v3192_v59 = vmax.f32 %v3165_v42, %v1445_v63  ;;  %v3194_v2 = vmax.f32 %v1426_v35, %v1451_v0  ;;  %v3196_v3 = vmax.f32 %v1423_v26, %v1443_v62  ;;  %v3199_v4 = vmax.f32 %v3167_v25, %v1444_v23  ;;  %v1539_v42 = vld [vmem:[#allocation4 + $0x1d0] sm:$0xff]  ;;  %v1522_v25 = vld [vmem:[#allocation4 + $0x148] sm:$0xff] }
 0x222   :  { %v1538_v26 = vld [vmem:[#allocation4 + $0x1c8] sm:$0xff]  ;;  %1610 = vmatpush.msrb.mxu3 %v1539_v42  ;;  %1591 = vmatpush.msra.mxu2 %v1522_v25  ;;  %v1634_v42 = vld [vmem:[%s3473_s5] sm:$0xff]  ;;  %v2480_v25 = vld [vmem:[%s3473_s5 + $0x10] sm:$0xff] }
 0x223   :  { %v2551_v5 = vpack.i.bf16 %v3194_v2, %v3192_v59  ;;  %v2556_v6 = vpack.i.bf16 %v3199_v4, %v3196_v3  ;;  %v1502_v35 = vld [vmem:[#allocation4 + $0xa8] sm:$0xff] }
 0x224   :  { %1611 = vmatpush.msrb.mxu3 %v1538_v26  ;;  %1592 = vmatpush.msra.mxu2 %v1521_v41  ;;  %v2568_v26 = vld [vmem:[#allocation6 + $0x6] ss:$0 sm:$0xff]  ;;  %v2564_v41 = vld [vmem:[#allocation6 + $0x7] ss:$0 sm:$0xff] }
 0x225   :  { %2552 = vrot.lane.b32.xlu1 %v2551_v5, %s2738_s17  ;;  %2557 = vrot.lane.b32.xlu2 %v2556_v6, %s2738_s17  ;;  %s2742_s17 = smov 9  }
 0x226   :  { %1612 = vmatpush.msrb.mxu3 %v1537_v28  ;;  %1593 = vmatpush.msra.mxu2 %v1520_v30 }
 0x227   :  { %1575 = vmatpush.msrb.mxu1 %v1502_v35  ;;  %v2481_v35 = vld [vmem:[%s3473_s5 + $0x18] sm:$0xff] }
 0x228   :  { %1613 = vmatpush.msrb.mxu3 %v1536_v31  ;;  %1594 = vmatpush.msra.mxu2 %v1519_v33 }
 0x229   :  { %1576 = vmatpush.msrb.mxu1 %v1501_v38  ;;  %v2006_v38 = vld [vmem:[%s3474_s6 + $0x8] sm:$0xff] }
 0x22a   :  { %1614 = vmatpush.msrb.mxu3 %v1535_v34  ;;  %1595 = vmatpush.msra.mxu2 %v1518_v36  ;;  %v1635_v34 = vld [vmem:[%s3473_s5 + $0x8] sm:$0xff] }
 0x22b   :  { %1577 = vmatpush.msrb.mxu1 %v1500_v43 }
 0x22c   :  { %1615 = vmatpush.msrb.mxu3 %v1534_v37  ;;  %1596 = vmatpush.msra.mxu2 %v1517_v39  ;;  %v2570_v37 = vld [vmem:[#allocation6 + $0x8] ss:$0 sm:$0xff]  ;;  %v2571_v39 = vld [vmem:[#allocation6 + $0x5] ss:$0 sm:$0xff] }
 0x22d   :  { %1578 = vmatpush.msrb.mxu1 %v1499_v46  ;;  %v2503_v46 = vld [vmem:[%s3473_s5 + $0x68] sm:$0xff] }
 0x22e   :  { %1616 = vmatpush.msrb.mxu3 %v1533_v40  ;;  %1597 = vmatpush.msra.mxu2 %v1516_v44  ;;  %v2005_v40 = vld [vmem:[%s3474_s6] sm:$0xff] }
 0x22f   :  { %1579 = vmatpush.msrb.mxu1 %v1498_v48  ;;  %v2494_v48 = vld [vmem:[%s3473_s5 + $0x40] sm:$0xff] }
 0x230   :  { %1617 = vmatpush.msrb.mxu3 %v1532_v45  ;;  %1598 = vmatpush.msra.mxu2 %v1515_v47 }
 0x231   :  { %1580 = vmatpush.msrb.mxu1 %v1497_v52  ;;  %v2491_v52 = vld [vmem:[%s3473_s5 + $0x38] sm:$0xff] }
 0x232   :  { %1618 = vmatpush.msrb.mxu3 %v1531_v49  ;;  %1599 = vmatpush.msra.mxu2 %v1514_v50  ;;  %v2490_v49 = vld [vmem:[%s3473_s5 + $0x30] sm:$0xff] }
 0x233   :  { %v2498_v50 = vld [vmem:[%s3473_s5 + $0x50] sm:$0xff] }
 0x234   :  { %1619 = vmatpush.msrb.mxu3 %v1530_v51  ;;  %1600 = vmatpush.msra.mxu2 %v1513_v53  ;;  %v2306_v51 = vld [vmem:[#allocation10] sm:$0xff]  ;;  %v2495_v53 = vld [vmem:[%s3473_s5 + $0x48] sm:$0xff] }
 0x236   :  { %1620 = vmatpush.msrb.mxu3 %v1529_v54  ;;  %v2499_v54 = vld [vmem:[%s3473_s5 + $0x58] sm:$0xff] }
 0x27f   :  { %v2558_v55 = vpop.permute.xlu2 %2557 }
 0x280   :  { %v2560_v56 = vunpack.i.h.bf16 %v2558_v55  ;;  %v2559_v57 = vunpack.i.l.bf16 %v2558_v55  ;;  %v2309_v55 = vld [vmem:[#allocation10 + $0x18] sm:$0xff] }
 0x282   :  { %v1468_v58 = vsel %vm1138_vm8, %v2559_v57, %v2560_v56 }
 0x283   :  { %v1477_v60 = vmax.f32 %v3196_v3, %v1468_v58  ;;  %v2507_v58 = vld [vmem:[%s3473_s5 + $0x78] sm:$0xff] }
 0x285   :  { %1561 = vmatmul.f32.vlgmr.msra.gmra.mxu0 %v1477_v60  ;;  %v2511_v60 = vld [vmem:[%s3473_s5 + $0x88] sm:$0xff] }
 0x297   :  { %v2553_v61 = vpop.permute.xlu1 %2552 }
 0x298   :  { %v2555_v62 = vunpack.i.h.bf16 %v2553_v61  ;;  %v2554_v23 = vunpack.i.l.bf16 %v2553_v61 }
 0x29a   :  { %v1469_v63 = vsel %vm1138_vm8, %v2560_v56, %v2554_v23  ;;  %v1470_v0 = vsel %vm1138_vm8, %v2554_v23, %v2555_v62  ;;  %v1476_v5 = vsel %vm1138_vm8, %v2555_v62, %v2559_v57  ;;  %v2506_v56 = vld [vmem:[%s3473_s5 + $0x70] sm:$0xff]  ;;  %v2510_v57 = vld [vmem:[%s3473_s5 + $0x80] sm:$0xff] }
 0x29b   :  { %v1478_v6 = vmax.f32 %v3199_v4, %v1469_v63  ;;  %v1479_v7 = vmax.f32 %v3192_v59, %v1470_v0  ;;  %v1480_v8 = vmax.f32 %v3194_v2, %v1476_v5  ;;  %v2563_v59 = vld [vmem:[#allocation6 + $0x2] ss:$0 sm:$0xff] }
 0x29d   :  { %1581 = vmatmul.f32.vlgmr.msrb.gmra.mxu1 %v1478_v6  ;;  %1601 = vmatmul.f32.vlgmr.msra.gmra.mxu2 %v1479_v7 }
 0x29e   :  { %1621 = vmatmul.f32.vlgmr.msrb.gmra.mxu3 %v1480_v8 }
 0x302   :  { %v1562_v9 = vpop.f32.mrf.mxu0 }
 0x31a   :  { %v1582_v3 = vpop.f32.mrf.mxu1 }
 0x31b   :  { %v1583_v1 = vadd.f32 %v1582_v3, %v1562_v9 }
 0x320   :  { %v1602_v10 = vpop.f32.mrf.mxu2 }
 0x321   :  { %v1603_v11 = vadd.f32 %v1602_v10, %v1583_v1  ;;  %v1622_v12 = vpop.f32.mrf.mxu3 }
 0x323   :  { %v1623_v13 = vadd.f32 %v1622_v12, %v1603_v11 }
 0x325   :  { %1707 = vrot.lane.b32.xlu2 %v1623_v13, %s2741_s12  ;;  %1636 = vrot.lane.b32.xlu1 %v1623_v13, %s2726_s22  ;;  %v1798_v22 = vmul.f32 %v2567_v16, %v1623_v13 }
 0x326   :  { %1626 = vrot.lane.b32.xlu0 %v1623_v13, %s2742_s17 }
 0x32d   :  { %1919 = vrot.lane.b32.xlu2 %v1623_v13, %s2743_s7  ;;  %1876 = vrot.lane.b32.xlu1 %v1623_v13, %s2744_s23 }
 0x32e   :  { %1750 = vrot.lane.b32.xlu0 %v1623_v13, %s2731_s2 }
 0x335   :  { %1962 = vrot.lane.b32.xlu1 %v1623_v13, %s2745_s24  ;;  %2009 = vperm.xlu2 %2561, %v2005_v40   ;;  %v2056_v40 = vld [vmem:[%s3476_s8 + $0x78] sm:$0xff] }
 0x336   :  { %1833 = vrot.lane.b32.xlu0 %v1623_v13, %s2736_s15 }
 0x33e   :  { %2014 = vperm.xlu0 %2562, %v2006_v38  }
 0x346   :  { %2312 = vperm.xlu0 %2562, %v2306_v51   ;;  %v2047_v51 = vld [vmem:[%s3476_s8 + $0x30] sm:$0xff] }
 0x34e   :  { %2327 = vperm.xlu0 %2562, %v2309_v55   ;;  %v2043_v55 = vld [vmem:[%s3476_s8 + $0x10] sm:$0xff] }
 0x37f   :  { %v1708_v2 = vpop.permute.xlu2 %1707 }
 0x380   :  { %v1715_v4 = vmul.f32 %v2563_v59, %v1708_v2 }
 0x382   :  { %1740 = vmatpush.msrb.mxu2 %v1715_v4 }
 0x383   :  { %2488 = vmatmul.msk.f32.vlgmr.msrb.gmra.mxu2 %vm1639_vm10, %v2486_v14 }
 0x387   :  { %v1920_v29 = vpop.permute.xlu2 %1919 }
 0x388   :  { %v1927_v36 = vmul.f32 %v2564_v41, %v1920_v29 }
 0x38b   :  { %2489 = vmatmul.msk.f32.gmra.mxu2 %vm1639_vm10, %v2487_v15 }
 0x397   :  { %v1637_v19 = vpop.permute.xlu1 %1636 }
 0x398   :  { %v1645_v20 = vmul.f32 %v2565_v17, %v1637_v19  ;;  %v1627_v21 = vpop.permute.xlu0 %1626 }
 0x399   :  { %v1633_v24 = vmul.f32 %v2566_v18, %v1627_v21  ;;  %v2010_v21 = vpop.permute.xlu2 %2009 }
 0x39a   :  { %1670 = vmatpush.msrb.mxu0 %v1645_v20 }
 0x39b   :  { %1699 = vmatpush.msra.mxu3 %v1633_v24  ;;  %2482 = vmatmul.msk.f32.vlgmr.msrb.gmra.mxu0 %vm1639_vm10, %v2480_v25 }
 0x39c   :  { %1823 = vmatpush.msra.mxu0 %v1798_v22  ;;  %2484 = vmatmul.msk.f32.vlgmr.msra.gmra.mxu3 %vm1639_vm10, %v1634_v42 }
 0x39f   :  { %v1877_v28 = vpop.permute.xlu1 %1876 }
 0x3a0   :  { %v1884_v30 = vmul.f32 %v2568_v26, %v1877_v28  ;;  %v1751_v31 = vpop.permute.xlu0 %1750 }
 0x3a1   :  { %v1758_v33 = vmul.f32 %v2569_v27, %v1751_v31 }
 0x3a2   :  { %1909 = vmatpush.msra.mxu2 %v1884_v30 }
 0x3a3   :  { %1783 = vmatpush.msrb.mxu3 %v1758_v33  ;;  %2504 = vmatmul.msk.f32.vlgmr.msra.gmra.mxu2 %vm1639_vm10, %v2502_v32 }
 0x3a4   :  { %2485 = vmatmul.msk.f32.gmra.mxu3 %vm1639_vm10, %v1635_v34  ;;  %2483 = vmatmul.msk.f32.gmra.mxu0 %vm1639_vm10, %v2481_v35 }
 0x3a5   :  { %1952 = vmatpush.msra.mxu3 %v1927_v36  ;;  %v2308_v36 = vld [vmem:[#allocation10 + $0x10] sm:$0xff] }
 0x3a7   :  { %v1963_v43 = vpop.permute.xlu1 %1962 }
 0x3a8   :  { %v1970_v44 = vmul.f32 %v2570_v37, %v1963_v43  ;;  %v1834_v45 = vpop.permute.xlu0 %1833  ;;  %v2055_v43 = vld [vmem:[%s3476_s8 + $0x70] sm:$0xff] }
 0x3a9   :  { %v1841_v47 = vmul.f32 %v2571_v39, %v1834_v45  ;;  %v2307_v39 = vld [vmem:[#allocation10 + $0x8] sm:$0xff] }
 0x3aa   :  { %1995 = vmatpush.msrb.mxu0 %v1970_v44  ;;  %v2054_v44 = vld [vmem:[%s3476_s8 + $0x68] sm:$0xff]  ;;  %v2053_v45 = vld [vmem:[%s3476_s8 + $0x60] sm:$0xff] }
 0x3ab   :  { %1866 = vmatpush.msra.mxu1 %v1841_v47  ;;  %2505 = vmatmul.msk.f32.gmra.mxu2 %vm1639_vm10, %v2503_v46  ;;  %v2052_v46 = vld [vmem:[%s3476_s8 + $0x58] sm:$0xff]  ;;  %v2051_v47 = vld [vmem:[%s3476_s8 + $0x50] sm:$0xff] }
 0x3ac   :  { %2492 = vmatmul.msk.f32.vlgmr.msrb.gmra.mxu3 %vm1639_vm10, %v2490_v49  ;;  %2496 = vmatmul.msk.f32.vlgmr.msra.gmra.mxu0 %vm1639_vm10, %v2494_v48  ;;  %v2050_v49 = vld [vmem:[%s3476_s8 + $0x48] sm:$0xff]  ;;  %v2049_v48 = vld [vmem:[%s3476_s8 + $0x40] sm:$0xff] }
 0x3ad   :  { %2500 = vmatmul.msk.f32.vlgmr.msra.gmra.mxu1 %vm1639_vm10, %v2498_v50  ;;  %v2048_v50 = vld [vmem:[%s3476_s8 + $0x38] sm:$0xff] }
 0x3ae   :  { %2057 = vmatpush.msrb.mxu1 %v2056_v40 }
 0x3b0   :  { %v2015_v30 = vpop.permute.xlu0 %2014  ;;  %2058 = vmatpush.msrb.mxu1 %v2055_v43  ;;  %v2177_v43 = vld [vmem:[#allocation7 + $0xe0] sm:$0xff] }
 0x3b2   :  { %2059 = vmatpush.msrb.mxu1 %v2054_v44  ;;  %v2136_v44 = vld [vmem:[#allocation7 + $0x88] sm:$0xff] }
 0x3b4   :  { %2493 = vmatmul.msk.f32.gmra.mxu3 %vm1639_vm10, %v2491_v52  ;;  %2497 = vmatmul.msk.f32.gmra.mxu0 %vm1639_vm10, %v2495_v53  ;;  %v2046_v52 = vld [vmem:[%s3476_s8 + $0x28] sm:$0xff]  ;;  %v2045_v53 = vld [vmem:[%s3476_s8 + $0x20] sm:$0xff] }
 0x3b5   :  { %2501 = vmatmul.msk.f32.gmra.mxu1 %vm1639_vm10, %v2499_v54  ;;  %v2044_v54 = vld [vmem:[%s3476_s8 + $0x18] sm:$0xff] }
 0x3b6   :  { %2060 = vmatpush.msrb.mxu1 %v2053_v45  ;;  %v2150_v45 = vld [vmem:[#allocation7 + $0xa8] sm:$0xff] }
 0x3b8   :  { %2061 = vmatpush.msrb.mxu1 %v2052_v46 }
 0x3ba   :  { %2062 = vmatpush.msrb.mxu1 %v2051_v47 }
 0x3bc   :  { %2508 = vmatmul.msk.f32.vlgmr.msra.gmra.mxu3 %vm1639_vm10, %v2506_v56  ;;  %2512 = vmatmul.msk.f32.vlgmr.msrb.gmra.mxu0 %vm1639_vm10, %v2510_v57  ;;  %v2042_v56 = vld [vmem:[%s3476_s8 + $0x8] sm:$0xff]  ;;  %v2041_v57 = vld [vmem:[%s3476_s8] sm:$0xff] }
 0x3bd   :  { %2063 = vmatpush.msrb.mxu1 %v2050_v49 }
 0x3bf   :  { %2064 = vmatpush.msrb.mxu1 %v2049_v48 }
 0x3c1   :  { %2065 = vmatpush.msrb.mxu1 %v2048_v50  ;;  %v2164_v50 = vld [vmem:[#allocation7 + $0xc8] sm:$0xff] }
 0x3c3   :  { %2066 = vmatpush.msrb.mxu1 %v2047_v51  ;;  %v2109_v51 = vld [vmem:[#allocation7 + $0x50] sm:$0xff] }
 0x3c4   :  { %2509 = vmatmul.msk.f32.gmra.mxu3 %vm1639_vm10, %v2507_v58  ;;  %2513 = vmatmul.msk.f32.gmra.mxu0 %vm1639_vm10, %v2511_v60 }
 0x3c5   :  { %2067 = vmatpush.msrb.mxu1 %v2046_v52 }
 0x3c7   :  { %2068 = vmatpush.msrb.mxu1 %v2045_v53 }
 0x3c9   :  { %2069 = vmatpush.msrb.mxu1 %v2044_v54 }
 0x3cb   :  { %2070 = vmatpush.msrb.mxu1 %v2043_v55  ;;  %v2178_v55 = vld [vmem:[#allocation7 + $0xe8] sm:$0xff] }
 0x3cd   :  { %2071 = vmatpush.msrb.mxu1 %v2042_v56 }
 0x3cf   :  { %2072 = vmatpush.msrb.mxu1 %v2041_v57  ;;  %v2191_v57 = vld [vmem:[#allocation7 + $0x100] sm:$0xff] }
 0x406   :  { %v1742_v63 = vpop.f32.mrf.mxu2 }
 0x40e   :  { %v1745_v3 = vpop.f32.mrf.mxu2 }
 0x418   :  { %v1672_v61 = vpop.f32.mrf.mxu0 }
 0x41f   :  { %v1701_v62 = vpop.f32.mrf.mxu3 }
 0x420   :  { %v1702_v6 = vadd.f32 %v1701_v62, %v1672_v61 }
 0x421   :  { %v1675_v23 = vpop.f32.mrf.mxu0 }
 0x422   :  { %v1748_v8 = vadd.f32 %v1742_v63, %v1702_v6  ;;  %v2304_v63 = vld [vmem:[#allocation9 + $0x10] sm:$0xff] }
 0x426   :  { %v1911_v2 = vpop.f32.mrf.mxu2 }
 0x427   :  { %v1704_v0 = vpop.f32.mrf.mxu3 }
 0x428   :  { %v1705_v10 = vadd.f32 %v1704_v0, %v1675_v23  ;;  %v2305_v23 = vld [vmem:[#allocation9 + $0x18] sm:$0xff]  ;;  %v2303_v0 = vld [vmem:[#allocation9 + $0x8] sm:$0xff] }
 0x429   :  { %v1825_v5 = vpop.f32.mrf.mxu0  ;;  %2354 = vmatpush.msrb.mxu2 %v2305_v23  ;;  %v2123_v23 = vld [vmem:[#allocation7 + $0x70] sm:$0xff] }
 0x42a   :  { %v1868_v11 = vpop.f32.mrf.mxu1  ;;  %v1749_v59 = vadd.f32 %v1745_v3, %v1705_v10  ;;  %v2093_v3 = vld [vmem:[#allocation7 + $0x20] sm:$0xff]  ;;  %v2094_v10 = vld [vmem:[#allocation7 + $0x28] sm:$0xff] }
 0x42b   :  { %2355 = vmatpush.msrb.mxu2 %v2304_v63 }
 0x42d   :  { %2356 = vmatpush.msrb.mxu2 %v2303_v0 }
 0x42e   :  { %v1914_v22 = vpop.f32.mrf.mxu2 }
 0x42f   :  { %v1785_v7 = vpop.f32.mrf.mxu3 }
 0x430   :  { %v1791_v9 = vadd.f32 %v1785_v7, %v1748_v8  ;;  %v2083_v7 = vld [vmem:[#allocation7] sm:$0xff] }
 0x431   :  { %v1828_v1 = vpop.f32.mrf.mxu0 }
 0x432   :  { %v1831_v12 = vadd.f32 %v1825_v5, %v1791_v9  ;;  %v1871_v16 = vpop.f32.mrf.mxu1  ;;  %v2302_v5 = vld [vmem:[#allocation9] sm:$0xff] }
 0x433   :  { %2357 = vmatpush.msrb.mxu2 %v2302_v5 }
 0x434   :  { %v1874_v4 = vadd.f32 %v1868_v11, %v1831_v12 }
 0x436   :  { %v1917_v17 = vadd.f32 %v1911_v2, %v1874_v4 }
 0x437   :  { %v1788_v13 = vpop.f32.mrf.mxu3 }
 0x438   :  { %v1792_v14 = vadd.f32 %v1788_v13, %v1749_v59  ;;  %v2107_v13 = vld [vmem:[#allocation7 + $0x40] sm:$0xff] }
 0x439   :  { %v1997_v15 = vpop.f32.mrf.mxu0 }
 0x43a   :  { %v1832_v18 = vadd.f32 %v1828_v1, %v1792_v14  ;;  %v2084_v1 = vld [vmem:[#allocation7 + $0x8] sm:$0xff] }
 0x43c   :  { %v1875_v24 = vadd.f32 %v1871_v16, %v1832_v18 }
 0x43e   :  { %v1918_v26 = vadd.f32 %v1914_v22, %v1875_v24 }
 0x43f   :  { %v1954_v19 = vpop.f32.mrf.mxu3 }
 0x440   :  { %v1960_v20 = vadd.f32 %v1954_v19, %v1917_v17  ;;  %v2085_v19 = vld [vmem:[#allocation7 + $0x10] sm:$0xff] }
 0x441   :  { %v2000_v28 = vpop.f32.mrf.mxu0 }
 0x442   :  { %v2003_v42 = vadd.f32 %v1997_v15, %v1960_v20  ;;  %v2121_v15 = vld [vmem:[#allocation7 + $0x60] sm:$0xff]  ;;  %v2095_v20 = vld [vmem:[#allocation7 + $0x30] sm:$0xff] }
 0x444   :  { %v2017_v25 = vadd.f32 %v2010_v21, %v2003_v42  ;;  %v2135_v21 = vld [vmem:[#allocation7 + $0x80] sm:$0xff] }
 0x446   :  { %v2019_v27 = vmax.f32 %v2017_v25, 0.0 }
 0x447   :  { %v1957_v41 = vpop.f32.mrf.mxu3 }
 0x448   :  { %v1961_v29 = vadd.f32 %v1957_v41, %v1918_v26  ;;  %2023 = vrot.lane.b32.xlu1 %v2019_v27, %s2736_s15  ;;  %v2108_v26 = vld [vmem:[#allocation7 + $0x48] sm:$0xff] }
 0x44a   :  { %v2004_v31 = vadd.f32 %v2000_v28, %v1961_v29  ;;  %v2086_v29 = vld [vmem:[#allocation7 + $0x18] sm:$0xff] }
 0x44c   :  { %v2018_v32 = vadd.f32 %v2015_v30, %v2004_v31  ;;  %v2096_v31 = vld [vmem:[#allocation7 + $0x38] sm:$0xff] }
 0x44e   :  { %v2020_v33 = vmax.f32 %v2018_v32, 0.0 }
 0x450   :  { %2025 = vrot.lane.b32.xlu2 %v2020_v33, %s2736_s15 }
 0x4aa   :  { %v2026_v34 = vpop.permute.xlu2 %2025 }
 0x4ab   :  { %v2030_v35 = vmax.f32 %v2020_v33, %v2026_v34 }
 0x4ad   :  { %2035 = vrot.lane.b32.xlu2 %v2030_v35, %s2743_s7 }
 0x4b5   :  { %2322 = vperm.xlu2 %2561, %v2308_v36  }
 0x4ba   :  { %v2024_v37 = vpop.permute.xlu1 %2023 }
 0x4bb   :  { %v2029_v38 = vmax.f32 %v2019_v27, %v2024_v37  ;;  %v2149_v27 = vld [vmem:[#allocation7 + $0xa0] sm:$0xff] }
 0x4bc   :  { %v2163_v37 = vld [vmem:[#allocation7 + $0xc0] sm:$0xff] }
 0x4bd   :  { %2033 = vrot.lane.b32.xlu1 %v2029_v38, %s2743_s7 }
 0x4c5   :  { %2317 = vperm.xlu1 %2540, %v2307_v39  }
 0x507   :  { %v2036_v61 = vpop.permute.xlu2 %2035 }
 0x508   :  { %v2040_v62 = vmax.f32 %v2030_v35, %v2036_v61  ;;  %v2122_v35 = vld [vmem:[#allocation7 + $0x68] sm:$0xff] }
 0x52f   :  { %v2034_v58 = vpop.permute.xlu1 %2033 }
 0x530   :  { %v2039_v60 = vmax.f32 %v2029_v38, %v2034_v58 }
 0x532   :  { %2073 = vmatmul.f32.vlgmr.msrb.gmra.mxu1 %v2039_v60 }
 0x53a   :  { %2076 = vmatmul.f32.gmra.mxu1 %v2040_v62 }
 0x5af   :  { %v2074_v6 = vpop.f32.mrf.mxu1 }
 0x5b0   :  { %v2087_v8 = vperm.slane %v2074_v6, 0  ;;  %v2097_v9 = vperm.slane %v2074_v6, 1  ;;  %2081 = vst.msk [vmem:[%s3481_s13] sm:$0xff] %vm2080_vm11, %v2074_v6  ;;  %v3353_v11 = vperm.slane %v2074_v6, 2  ;;  %v3355_v2 = vperm.slane %v2074_v6, 3 }
 0x5b1   :  { %v3358_v16 = vperm.slane %v2074_v6, 4  ;;  %v3361_v22 = vperm.slane %v2074_v6, 5  ;;  %v3365_v41 = vperm.slane %v2074_v6, 6  ;;  %v3373_v36 = vperm.slane %v2074_v6, 7 }
 0x5b2   :  { %v2088_v12 = vmul.f32 %v2087_v8, %v2083_v7  ;;  %v2098_v59 = vmul.f32 %v2097_v9, %v2093_v3  ;;  %v2089_v4 = vmul.f32 %v2087_v8, %v2084_v1  ;;  %v2099_v14 = vmul.f32 %v2097_v9, %v2094_v10  ;;  %v2205_v3 = vld [vmem:[#allocation7 + $0x120] sm:$0xff]  ;;  %v2137_v10 = vld [vmem:[#allocation7 + $0x90] sm:$0xff] }
 0x5b3   :  { %v2112_v18 = vmul.f32 %v3353_v11, %v2107_v13  ;;  %v2126_v42 = vmul.f32 %v3355_v2, %v2121_v15  ;;  %v2090_v30 = vmul.f32 %v2087_v8, %v2085_v19  ;;  %v2100_v32 = vmul.f32 %v2097_v9, %v2095_v20  ;;  %v2151_v20 = vld [vmem:[#allocation7 + $0xb0] sm:$0xff] }
 0x5b4   :  { %v2102_v17 = vadd.f32 %v2098_v59, %v2088_v12  ;;  %v2103_v28 = vadd.f32 %v2099_v14, %v2089_v4  ;;  %v2140_v34 = vmul.f32 %v3358_v16, %v2135_v21  ;;  %v2113_v38 = vmul.f32 %v3353_v11, %v2108_v26  ;;  %v2219_v59 = vld [vmem:[#allocation7 + $0x140] sm:$0xff]  ;;  %v2110_v21 = vld [vmem:[#allocation7 + $0x58] sm:$0xff] }
 0x5b5   :  { %v2154_v39 = vmul.f32 %v3361_v22, %v2149_v27  ;;  %v2091_v46 = vmul.f32 %v2087_v8, %v2086_v29  ;;  %v2101_v47 = vmul.f32 %v2097_v9, %v2096_v31  ;;  %v2127_v48 = vmul.f32 %v3355_v2, %v2122_v35  ;;  %v2233_v26 = vld [vmem:[#allocation7 + $0x160] sm:$0xff]  ;;  %v2192_v27 = vld [vmem:[#allocation7 + $0x108] sm:$0xff]  ;;  %v2124_v35 = vld [vmem:[#allocation7 + $0x78] sm:$0xff] }
 0x5b6   :  { %v2116_v24 = vadd.f32 %v2112_v18, %v2102_v17  ;;  %v2117_v49 = vadd.f32 %v2113_v38, %v2103_v28  ;;  %v2168_v54 = vmul.f32 %v3365_v41, %v2163_v37  ;;  %v2104_v56 = vadd.f32 %v2100_v32, %v2090_v30  ;;  %v2165_v30 = vld [vmem:[#allocation7 + $0xd0] sm:$0xff]  ;;  %v2247_v38 = vld [vmem:[#allocation7 + $0x180] sm:$0xff] }
 0x5b7   :  { %v3363_v25 = vpop.f32.mrf.mxu1  ;;  %v2182_v58 = vmul.f32 %v3373_v36, %v2177_v43  ;;  %v2141_v61 = vmul.f32 %v3358_v16, %v2136_v44  ;;  %v2155_v62 = vmul.f32 %v3361_v22, %v2150_v45  ;;  %v2169_v5 = vmul.f32 %v3365_v41, %v2164_v50  ;;  %v2179_v44 = vld [vmem:[#allocation7 + $0xf0] sm:$0xff] }
 0x5b8   :  { %2082 = vst.msk [vmem:[%s3481_s13 + $0x8] sm:$0xff] %vm2080_vm11, %v3363_v25  ;;  %v2130_v33 = vadd.f32 %v2126_v42, %v2116_v24  ;;  %v3379_v52 = vperm.slane %v3363_v25, 0  ;;  %v2131_v60 = vadd.f32 %v2127_v48, %v2117_v49  ;;  %v3386_v63 = vperm.slane %v3363_v25, 1 }
 0x5b9   :  { %v2114_v6 = vmul.f32 %v3353_v11, %v2109_v51  ;;  %v3391_v7 = vperm.slane %v3363_v25, 2  ;;  %v3394_v8 = vperm.slane %v3363_v25, 3  ;;  %v2183_v1 = vmul.f32 %v3373_v36, %v2178_v55  ;;  %v2138_v51 = vld [vmem:[#allocation7 + $0x98] sm:$0xff]  ;;  %v2193_v55 = vld [vmem:[#allocation7 + $0x110] sm:$0xff] }
 0x5ba   :  { %v2144_v40 = vadd.f32 %v2140_v34, %v2130_v33  ;;  %v2145_v9 = vadd.f32 %v2141_v61, %v2131_v60  ;;  %v2196_v12 = vmul.f32 %v3379_v52, %v2191_v57  ;;  %v2128_v14 = vmul.f32 %v3355_v2, %v2123_v23 }
 0x5bb   :  { %v2118_v4 = vadd.f32 %v2114_v6, %v2104_v56  ;;  %v3400_v15 = vperm.slane %v3363_v25, 4  ;;  %v3403_v17 = vperm.slane %v3363_v25, 5  ;;  %v3406_v18 = vperm.slane %v3363_v25, 6 }
 0x5bc   :  { %v2158_v53 = vadd.f32 %v2154_v39, %v2144_v40  ;;  %v2159_v19 = vadd.f32 %v2155_v62, %v2145_v9  ;;  %v2210_v42 = vmul.f32 %v3386_v63, %v2205_v3  ;;  %v2142_v29 = vmul.f32 %v3358_v16, %v2137_v10  ;;  %v2206_v39 = vld [vmem:[#allocation7 + $0x128] sm:$0xff]  ;;  %v2152_v62 = vld [vmem:[#allocation7 + $0xb8] sm:$0xff]  ;;  %v2207_v3 = vld [vmem:[#allocation7 + $0x130] sm:$0xff] }
 0x5bd   :  { %v2132_v28 = vadd.f32 %v2128_v14, %v2118_v4  ;;  %v3411_v31 = vperm.slane %v3363_v25, 7  ;;  %v2224_v32 = vmul.f32 %v3391_v7, %v2219_v59  ;;  %v2105_v34 = vadd.f32 %v2101_v47, %v2091_v46  ;;  %v2261_v46 = vld [vmem:[#allocation7 + $0x1a0] sm:$0xff]  ;;  %v2220_v47 = vld [vmem:[#allocation7 + $0x148] sm:$0xff]  ;;  %v2166_v59 = vld [vmem:[#allocation7 + $0xd8] sm:$0xff] }
 0x5be   :  { %v2172_v0 = vadd.f32 %v2168_v54, %v2158_v53  ;;  %v2173_v33 = vadd.f32 %v2169_v5, %v2159_v19  ;;  %v2156_v43 = vmul.f32 %v3361_v22, %v2151_v20  ;;  %v2115_v45 = vmul.f32 %v3353_v11, %v2110_v21  ;;  %v2234_v5 = vld [vmem:[#allocation7 + $0x168] sm:$0xff]  ;;  %v2289_v14 = vld [vmem:[#allocation7 + $0x1e0] sm:$0xff]  ;;  %v2221_v21 = vld [vmem:[#allocation7 + $0x150] sm:$0xff] }
 0x5bf   :  { %v2146_v40 = vadd.f32 %v2142_v29, %v2132_v28  ;;  %v2238_v49 = vmul.f32 %v3394_v8, %v2233_v26  ;;  %v2197_v25 = vmul.f32 %v3379_v52, %v2192_v27  ;;  %v2170_v50 = vmul.f32 %v3365_v41, %v2165_v30  ;;  %v2248_v19 = vld [vmem:[#allocation7 + $0x188] sm:$0xff]  ;;  %v2180_v29 = vld [vmem:[#allocation7 + $0xf8] sm:$0xff] }
 0x5c0   :  { %v2186_v13 = vadd.f32 %v2182_v58, %v2172_v0  ;;  %v2187_v48 = vadd.f32 %v2183_v1, %v2173_v33  ;;  %v2119_v56 = vadd.f32 %v2115_v45, %v2105_v34  ;;  %v2129_v57 = vmul.f32 %v3355_v2, %v2124_v35  ;;  %v2275_v0 = vld [vmem:[#allocation7 + $0x1c0] sm:$0xff]  ;;  %v2235_v34 = vld [vmem:[#allocation7 + $0x170] sm:$0xff]  ;;  %v2276_v45 = vld [vmem:[#allocation7 + $0x1c8] sm:$0xff] }
 0x5c1   :  { %v2160_v54 = vadd.f32 %v2156_v43, %v2146_v40  ;;  %v2252_v58 = vmul.f32 %v3400_v15, %v2247_v38  ;;  %v2211_v11 = vmul.f32 %v3386_v63, %v2206_v39  ;;  %v2184_v61 = vmul.f32 %v3373_v36, %v2179_v44  ;;  %v2194_v43 = vld [vmem:[#allocation7 + $0x118] sm:$0xff] }
 0x5c2   :  { %v2200_v24 = vadd.f32 %v2196_v12, %v2186_v13  ;;  %v2201_v60 = vadd.f32 %v2197_v25, %v2187_v48  ;;  %v2133_v9 = vadd.f32 %v2129_v57, %v2119_v56  ;;  %v2143_v1 = vmul.f32 %v3358_v16, %v2138_v51 }
 0x5c3   :  { %v2174_v6 = vadd.f32 %v2170_v50, %v2160_v54  ;;  %v2266_v10 = vmul.f32 %v3403_v17, %v2261_v46  ;;  %v2225_v2 = vmul.f32 %v3391_v7, %v2220_v47  ;;  %v2198_v13 = vmul.f32 %v3379_v52, %v2193_v55  ;;  %v2208_v46 = vld [vmem:[#allocation7 + $0x138] sm:$0xff] }
 0x5c4   :  { %v2214_v37 = vadd.f32 %v2210_v42, %v2200_v24  ;;  %v2215_v12 = vadd.f32 %v2211_v11, %v2201_v60  ;;  %v2147_v24 = vadd.f32 %v2143_v1, %v2133_v9  ;;  %v2157_v42 = vmul.f32 %v3361_v22, %v2152_v62  ;;  %v2222_v60 = vld [vmem:[#allocation7 + $0x158] sm:$0xff] }
 0x5c5   :  { %v2188_v20 = vadd.f32 %v2184_v61, %v2174_v6  ;;  %v2280_v26 = vmul.f32 %v3406_v18, %v2275_v0  ;;  %v2239_v16 = vmul.f32 %v3394_v8, %v2234_v5  ;;  %v2212_v28 = vmul.f32 %v3386_v63, %v2207_v3  ;;  %v2263_v0 = vld [vmem:[#allocation7 + $0x1b0] sm:$0xff]  ;;  %v2236_v5 = vld [vmem:[#allocation7 + $0x178] sm:$0xff] }
 0x5c6   :  { %v2228_v53 = vadd.f32 %v2224_v32, %v2214_v37  ;;  %v2229_v27 = vadd.f32 %v2225_v2, %v2215_v12  ;;  %v2262_v32 = vld [vmem:[#allocation7 + $0x1a8] sm:$0xff]  ;;  %v2161_v35 = vadd.f32 %v2157_v42, %v2147_v24  ;;  %v2171_v37 = vmul.f32 %v3365_v41, %v2166_v59  ;;  %v2249_v41 = vld [vmem:[#allocation7 + $0x190] sm:$0xff]  ;;  %v2250_v59 = vld [vmem:[#allocation7 + $0x198] sm:$0xff] }
 0x5c7   :  { %v2202_v33 = vadd.f32 %v2198_v13, %v2188_v20  ;;  %v2294_v38 = vmul.f32 %v3411_v31, %v2289_v14  ;;  %v2253_v22 = vmul.f32 %v3400_v15, %v2248_v19  ;;  %v2226_v40 = vmul.f32 %v3391_v7, %v2221_v21  ;;  %v2277_v13 = vld [vmem:[#allocation7 + $0x1d0] sm:$0xff] }
 0x5c8   :  { %v2242_v23 = vadd.f32 %v2238_v49, %v2228_v53  ;;  %v2243_v39 = vadd.f32 %v2239_v16, %v2229_v27  ;;  %v2175_v48 = vadd.f32 %v2171_v37, %v2161_v35  ;;  %v2185_v25 = vmul.f32 %v3373_v36, %v2180_v29  ;;  %v2291_v21 = vld [vmem:[#allocation7 + $0x1f0] sm:$0xff] }
 0x5c9   :  { %v2216_v49 = vadd.f32 %v2212_v28, %v2202_v33  ;;  %v2267_v51 = vmul.f32 %v3403_v17, %v2262_v32  ;;  %v2240_v53 = vmul.f32 %v3394_v8, %v2235_v34  ;;  %v2199_v56 = vmul.f32 %v3379_v52, %v2194_v43  ;;  %v2313_v34 = vpop.permute.xlu0 %2312 }
 0x5ca   :  { %v2256_v4 = vadd.f32 %v2252_v58, %v2242_v23  ;;  %v2257_v50 = vadd.f32 %v2253_v22, %v2243_v39  ;;  %v2189_v55 = vadd.f32 %v2185_v25, %v2175_v48  ;;  %v2281_v58 = vmul.f32 %v3406_v18, %v2276_v45  ;;  %v2290_v23 = vld [vmem:[#allocation7 + $0x1e8] sm:$0xff] }
 0x5cb   :  { %v2230_v54 = vadd.f32 %v2226_v40, %v2216_v49  ;;  %v2254_v36 = vmul.f32 %v3400_v15, %v2249_v41  ;;  %v2213_v62 = vmul.f32 %v3386_v63, %v2208_v46  ;;  %v2227_v52 = vmul.f32 %v3391_v7, %v2222_v60  ;;  %v2264_v7 = vld [vmem:[#allocation7 + $0x1b8] sm:$0xff] }
 0x5cc   :  { %v2270_v30 = vadd.f32 %v2266_v10, %v2256_v4  ;;  %v2271_v57 = vadd.f32 %v2267_v51, %v2257_v50  ;;  %v2203_v61 = vadd.f32 %v2199_v56, %v2189_v55  ;;  %v2295_v1 = vmul.f32 %v3411_v31, %v2290_v23 }
 0x5cd   :  { %v2244_v11 = vadd.f32 %v2240_v53, %v2230_v54  ;;  %v2268_v10 = vmul.f32 %v3403_v17, %v2263_v0  ;;  %v2241_v2 = vmul.f32 %v3394_v8, %v2236_v5  ;;  %v2282_v19 = vmul.f32 %v3406_v18, %v2277_v13  ;;  %v2278_v8 = vld [vmem:[#allocation7 + $0x1d8] sm:$0xff] }
 0x5ce   :  { %v2284_v44 = vadd.f32 %v2280_v26, %v2270_v30  ;;  %v2285_v6 = vadd.f32 %v2281_v58, %v2271_v57  ;;  %v2217_v9 = vadd.f32 %v2213_v62, %v2203_v61  ;;  %v2255_v20 = vmul.f32 %v3400_v15, %v2250_v59  ;;  %v2292_v30 = vld [vmem:[#allocation7 + $0x1f8] sm:$0xff] }
 0x5cf   :  { %v2258_v3 = vadd.f32 %v2254_v36, %v2244_v11  ;;  %v2296_v26 = vmul.f32 %v3411_v31, %v2291_v21  ;;  %v2269_v27 = vmul.f32 %v3403_v17, %v2264_v7  ;;  %v2283_v29 = vmul.f32 %v3406_v18, %v2278_v8  ;;  %v2318_v17 = vpop.permute.xlu1 %2317  ;;  %v2323_v18 = vpop.permute.xlu2 %2322 }
 0x5d0   :  { %v2298_v47 = vadd.f32 %v2294_v38, %v2284_v44  ;;  %v2231_v12 = vadd.f32 %v2227_v52, %v2217_v9  ;;  %v2299_v4 = vadd.f32 %v2295_v1, %v2285_v6  ;;  %v2297_v33 = vmul.f32 %v3411_v31, %v2292_v30 }
 0x5d1   :  { %v2272_v14 = vadd.f32 %v2268_v10, %v2258_v3  ;;  %v2328_v40 = vpop.permute.xlu0 %2327 }
 0x5d2   :  { %2514 = vmatmul.msk.f32.vlgmr.msrb.gmra.mxu2 %vm2080_vm11, %v2298_v47  ;;  %v2245_v63 = vadd.f32 %v2241_v2, %v2231_v12 }
 0x5d3   :  { %v2286_v24 = vadd.f32 %v2282_v19, %v2272_v14 }
 0x5d4   :  { %v2259_v42 = vadd.f32 %v2255_v20, %v2245_v63 }
 0x5d5   :  { %v2300_v16 = vadd.f32 %v2296_v26, %v2286_v24 }
 0x5d6   :  { %v2273_v28 = vadd.f32 %v2269_v27, %v2259_v42 }
 0x5d8   :  { %v2287_v32 = vadd.f32 %v2283_v29, %v2273_v28 }
 0x5da   :  { %2515 = vmatmul.msk.f32.gmra.mxu2 %vm2080_vm11, %v2299_v4  ;;  %v2301_v15 = vadd.f32 %v2297_v33, %v2287_v32 }
 0x5e2   :  { %2516 = vmatmul.msk.f32.gmra.mxu2 %vm2080_vm11, %v2300_v16 }
 0x5ea   :  { %2517 = vmatmul.msk.f32.gmra.mxu2 %vm2080_vm11, %v2301_v15 }
 0x655   :  { %v2359_v35 = vpop.f32.mrf.mxu2 }
 0x656   :  { %v2360_v37 = vadd.f32 %v2359_v35, %v2313_v34 }
 0x658   :  { %2372 = vst.msk [vmem:[%s3482_s14] sm:$0xff] %vm2371_vm12, %v2360_v37 }
 0x65d   :  { %v2362_v38 = vpop.f32.mrf.mxu2 }
 0x65e   :  { %v2363_v39 = vadd.f32 %v2362_v38, %v2318_v17 }
 0x660   :  { %2373 = vst.msk [vmem:[%s3482_s14 + $0x8] sm:$0xff] %vm2371_vm12, %v2363_v39 }
 0x665   :  { %v2365_v31 = vpop.f32.mrf.mxu2 }
 0x666   :  { %v2366_v22 = vadd.f32 %v2365_v31, %v2323_v18 }
 0x668   :  { %2374 = vst.msk [vmem:[%s3482_s14 + $0x10] sm:$0xff] %vm2371_vm12, %v2366_v22 }
 0x66d   :  { %v2368_v43 = vpop.f32.mrf.mxu2 }
 0x66e   :  { %v2369_v44 = vadd.f32 %v2368_v43, %v2328_v40 }
 0x670   :  { %2375 = vst.msk [vmem:[%s3482_s14 + $0x18] sm:$0xff] %vm2371_vm12, %v2369_v44 }
 0x671   :  { %2388 = vsyncpa [#allocation3], 1 }
 0x672   :  { %2389 = vsyncpa [#allocation5], 1 }
 0x673   :  { %2390 = vsyncpa [#allocation8], 1 }
 0x674   :  { %2391 = vsyncpa [#allocation11], 1 }

</bundles_post_ra>
